<compile_context>
chip_gen: v6e
topology: v6e:2x2x1
jax: 0.10.0
libtpu: 0.0.40
codegen_flags: <defaults>
</compile_context>

<pallas_src>
import functools

import jax
import jax.numpy as jnp
from jax import lax
from jax.experimental import pallas as pl
from jax.experimental.pallas import tpu as pltpu

_LANE = 128
_SUBLANE = 8
_T_BLOCK = 4      # prologue time-chunk size (== inner-loop unroll factor)
_UNROLL = 4       # timesteps per fori_loop body in the recurrence
_STATIC_T = 16    # fully unroll the time loop at/below this padded length


def _round_up(x, m):
    return ((x + m - 1) // m) * m


# ----------------------------------------------------------------------------
# Pallas kernel: masked GRU seq2vec (returns final hidden state per row)
# ----------------------------------------------------------------------------
def _gru_seq2vec_kernel(tmax_ref, len_ref, x_ref, wih_ref, whh_ref, bgx_ref,
                        bhn_ref, *rest, hidden_p, seq_len_pad, t_block,
                        unroll, has_h0):
    if has_h0:
        h0_ref, out_ref, gx_scr = rest
    else:
        out_ref, gx_scr = rest

    Hp = hidden_p
    Tp = seq_len_pad
    TB = t_block
    tile_n = x_ref.shape[1]
    d_in = x_ref.shape[2]

    # ---- Prologue: hoisted input projection, streamed in TB-sized time
    # chunks so the f32 matmul temporary stays bounded (not (Tp, ...)).
    # bf16 x bf16 -> f32 on the MXU, bias folded, stored as bf16.
    n_chunks = Tp // TB

    @pl.loop(0, n_chunks)
    def _(c):
        t0 = pl.multiple_of(c * TB, TB)
        xc = x_ref[pl.ds(t0, TB)].reshape(TB * tile_n, d_in)      # bf16
        g = jnp.dot(xc, wih_ref[...], preferred_element_type=jnp.float32)
        g = g + bgx_ref[...]
        gx_scr[pl.ds(t0, TB)] = g.reshape(TB, tile_n, 3 * Hp).astype(jnp.bfloat16)

    lengths = len_ref[...]          # (tile_n, 1) int32 — a single vreg

    def step(t, h):
        g = gx_scr[t].astype(jnp.float32)                          # (tile_n, 3Hp)
        # bf16 MXU matmul on the serial critical path, f32 accumulation.
        # whh/bhn are read from VMEM inside the loop (vld slots have slack;
        # avoids a big loop-carried SSA value / spill pressure).
        gh = jnp.dot(h.astype(jnp.bfloat16), whh_ref[...],
                     preferred_element_type=jnp.float32)
        r = jax.nn.sigmoid(g[:, 0:Hp] + gh[:, 0:Hp])
        z = jax.nn.sigmoid(g[:, Hp:2 * Hp] + gh[:, Hp:2 * Hp])
        n = jnp.tanh(g[:, 2 * Hp:] + r * (gh[:, 2 * Hp:] + bhn_ref[...]))
        h_new = (1.0 - z) * n + z * h
        # masked (right-padded) timesteps carry h_{t-1} (packed-seq semantics)
        return jnp.where(t < lengths, h_new, h)

    if has_h0:
        h = h0_ref[...]
    else:
        h = jnp.zeros((tile_n, Hp), jnp.float32)

    if Tp <= _STATIC_T:
        # short fixed trip count: full static unroll
        for t in range(Tp):
            h = step(t, h)
    else:
        # Bound the serial loop by this tile's max valid length (prefetched
        # into SMEM); fully-padded tail steps are skipped entirely.  Steps past
        # a row's own length still carry h via the mask above.
        tmax = tmax_ref[pl.program_id(0)]
        n_outer = (tmax + (unroll - 1)) // unroll   # Tp is a multiple of unroll

        def outer(i, hh):
            t0 = pl.multiple_of(i * unroll, unroll)
            for j in range(unroll):
                hh = step(t0 + j, hh)
            return hh

        h = lax.fori_loop(0, n_outer, outer, h)

    out_ref[...] = h


# ----------------------------------------------------------------------------
# Hardware / tiling helpers
# ----------------------------------------------------------------------------
def _tpu_vmem_capacity_bytes():
    try:
        return int(pltpu.get_tpu_info().vmem_capacity_bytes)
    except Exception:
        return 64 * 1024 * 1024        # conservative fallback (v7x per-core VMEM)


def _tile_n_cap():
    # v5e's MXU is 128-wide; 256-row tiles fill the 256-wide MXU on v6e / v7x.
    try:
        kind = jax.devices()[0].device_kind.lower()
    except Exception:
        return 128
    return 128 if "v5" in kind else 256


def _vmem_footprint(tn, t_pad, d, hp, has_h0):
    """Per-grid-step VMEM estimate (includes double-buffered weight blocks,
    the chunked prologue temporary, and compiler-internal slack)."""
    d_pad = _round_up(d, _LANE)
    fb = 0
    fb += 2 * t_pad * tn * d_pad * 2          # x block (bf16), double buffered
    fb += t_pad * tn * 3 * hp * 2             # gx scratch (bf16)
    fb += 2 * _T_BLOCK * tn * 3 * hp * 4      # prologue chunk f32 temp (+margin)
    fb += _T_BLOCK * tn * d_pad * 2           # chunk reshape copy (bf16)
    fb += (4 if has_h0 else 2) * tn * hp * 4  # h0 / out blocks, double buffered
    fb += 2 * tn * _LANE * 4                  # lengths block (lane padded)
    fb += 2 * d_pad * 3 * hp * 2              # W_ih bf16, double buffered
    fb += 2 * hp * 3 * hp * 2                 # W_hh bf16, double buffered
    fb += 4 * _SUBLANE * 4 * hp * 4           # bias blocks (padded)
    fb += 2 * 1024 * 1024                     # compiler-internal scratch slack
    return fb


def _pick_tile_n(n, t_pad, d, hp, has_h0, budget_bytes, tile_cap):
    """Largest TILE_N (multiple of 16, <= cap) whose footprint fits budget."""
    tile = min(tile_cap, max(16, _round_up(n, 16)))
    while tile > 16 and _vmem_footprint(tile, t_pad, d, hp, has_h0) > budget_bytes:
        tile -= 16
    return tile


def gru_seq2vec_pallas(x_tmajor, lengths, tile_max, h0, packed_params, *,
                       tile_n, est_bytes, vmem_capacity):
    """x_tmajor: (Tp, Np, D) bf16; lengths: (Np, 1) i32; tile_max: (Np/tile_n,)
    i32; h0: (Np, Hp) f32 or None  ->  (Np, Hp) f32."""
    Tp, Np, D = x_tmajor.shape
    wih_p, whh_p, bgx, bhn = packed_params
    Hp = whh_p.shape[0]
    assert Np % tile_n == 0
    grid = (Np // tile_n,)
    has_h0 = h0 is not None

    kernel = functools.partial(_gru_seq2vec_kernel, hidden_p=Hp,
                               seq_len_pad=Tp, t_block=_T_BLOCK,
                               unroll=_UNROLL, has_h0=has_h0)

    in_specs = [
        pl.BlockSpec((tile_n, 1), lambda i, tm: (i, 0)),          # lengths
        pl.BlockSpec((Tp, tile_n, D), lambda i, tm: (0, i, 0)),   # x (bf16)
        pl.BlockSpec((D, 3 * Hp), lambda i, tm: (0, 0)),          # W_ih^T bf16
        pl.BlockSpec((Hp, 3 * Hp), lambda i, tm: (0, 0)),         # W_hh^T bf16
        pl.BlockSpec((1, 3 * Hp), lambda i, tm: (0, 0)),          # fused bias
        pl.BlockSpec((1, Hp), lambda i, tm: (0, 0)),              # b_hn
    ]
    args = [tile_max, lengths, x_tmajor, wih_p, whh_p, bgx, bhn]
    if has_h0:
        in_specs.append(pl.BlockSpec((tile_n, Hp), lambda i, tm: (i, 0)))
        args.append(h0)

    # Generation-aware scoped-VMEM limit: cover the estimate with margin but
    # stay well under physical VMEM (~75%) so compiler scratch has headroom.
    vmem_limit = int(min(max(est_bytes * 1.3, 32 * 1024 * 1024),
                         vmem_capacity * 3 // 4))

    return pl.pallas_call(
        kernel,
        out_shape=jax.ShapeDtypeStruct((Np, Hp), jnp.float32),
        grid_spec=pltpu.PrefetchScalarGridSpec(
            num_scalar_prefetch=1,
            grid=grid,
            in_specs=in_specs,
            out_specs=pl.BlockSpec((tile_n, Hp), lambda i, tm: (i, 0)),
            scratch_shapes=[pltpu.VMEM((Tp, tile_n, 3 * Hp), jnp.bfloat16)],
        ),
        compiler_params=pltpu.CompilerParams(
            dimension_semantics=("parallel",),
            vmem_limit_bytes=vmem_limit),
    )(*args)


# ----------------------------------------------------------------------------
# Parameter packing: PyTorch GRU layout -> lane-aligned, gate-padded layout
# ----------------------------------------------------------------------------
def _prepare_gru_params(w_ih, w_hh, b_ih, b_hh):
    """w_ih (3H, D), w_hh (3H, H), b_ih (3H,), b_hh (3H,) — gate order [r,z,n]."""
    three_h, d = w_ih.shape
    h = three_h // 3
    hp = _round_up(h, _LANE)
    pad = hp - h

    wih3 = jnp.pad(w_ih.reshape(3, h, d).astype(jnp.float32),
                   ((0, 0), (0, pad), (0, 0)))
    wih_p = jnp.transpose(wih3, (2, 0, 1)).reshape(d, 3 * hp).astype(jnp.bfloat16)

    whh3 = jnp.pad(w_hh.reshape(3, h, h).astype(jnp.float32),
                   ((0, 0), (0, pad), (0, pad)))
    whh_p = jnp.transpose(whh3, (2, 0, 1)).reshape(hp, 3 * hp).astype(jnp.bfloat16)

    bih3 = b_ih.reshape(3, h).astype(jnp.float32)
    bhh3 = b_hh.reshape(3, h).astype(jnp.float32)
    # Fold b_hh's r/z slices into the hoisted projection bias; keep b_hn apart
    # (it lives inside r*(...) per PyTorch GRU semantics).
    bg = jnp.stack([bih3[0] + bhh3[0], bih3[1] + bhh3[1], bih3[2]], axis=0)
    bgx = jnp.pad(bg, ((0, 0), (0, pad))).reshape(1, 3 * hp)
    bhn = jnp.pad(bhh3[2], (0, pad)).reshape(1, hp)
    return wih_p, whh_p, bgx, bhn, h, hp


# ----------------------------------------------------------------------------
# TimeDistributedSeq2VecRNNChain forward (glue in JAX, hot path in Pallas)
# ----------------------------------------------------------------------------
def time_distributed_seq2vec_rnn_chain(x, params, mask=None, hidden_state=None):
    """
    x:            (B, G, T, D)
    params:       PyTorch-layout GRU params (W_ih, W_hh, b_ih, b_hh)
    mask:         (B, G, T) right-padded or None
    hidden_state: (L, B, G, H) or None (single-layer GRU: L == 1)
    returns:      (B, G, H)
    """
    B, G, T, D = x.shape
    w_ih, w_hh, b_ih, b_hh = params
    wih_p, whh_p, bgx, bhn, H, Hp = _prepare_gru_params(w_ih, w_hh, b_ih, b_hh)
    N = B * G
    Tp = _round_up(T, _T_BLOCK)
    has_h0 = hidden_state is not None

    capacity = _tpu_vmem_capacity_bytes()
    budget = capacity * 7 // 10                      # ~70% of physical VMEM
    tile_n = _pick_tile_n(N, Tp, D, Hp, has_h0, budget, _tile_n_cap())
    Np = _round_up(N, tile_n)
    # v7x has 2 TensorCores: the "parallel" grid axis can only be sharded if it
    # has >= 2 steps — halve the tile when one oversized tile covers everything.
    while Np // tile_n < 2 and tile_n > 16:
        tile_n = max(16, _round_up(tile_n // 2, 16))
        Np = _round_up(N, tile_n)
    est_bytes = _vmem_footprint(tile_n, Tp, D, Hp, has_h0)

    # bf16 activations: cast BEFORE the transpose/pad (halves transpose bytes
    # and the HBM->VMEM stream).  Only the small-D tensor is transposed.
    x_flat = x.reshape(N, T, D).astype(jnp.bfloat16)
    x_k = jnp.transpose(x_flat, (1, 0, 2))                    # (T, N, D)
    x_k = jnp.pad(x_k, ((0, Tp - T), (0, Np - N), (0, 0)))    # (Tp, Np, D)

    # Right-padded mask -> per-row valid length (packed-sequence semantics),
    # plus per-tile max length (scalar prefetch) to bound the serial loop.
    if mask is None:
        lengths = jnp.full((N,), T, dtype=jnp.int32)
    else:
        lengths = mask.reshape(N, T).astype(jnp.int32).sum(axis=-1)
    lengths = jnp.pad(lengths, (0, Np - N))
    tile_max = lengths.reshape(Np // tile_n, tile_n).max(axis=-1).astype(jnp.int32)
    lengths = lengths.reshape(Np, 1)

    if has_h0:
        L = hidden_state.shape[0]
        h0 = hidden_state.reshape(L, N, H)[0].astype(jnp.float32)
        h0 = jnp.pad(h0, ((0, Np - N), (0, Hp - H)))          # (Np, Hp)
    else:
        h0 = None   # zero state is created in-kernel (saves an HBM stream)

    out = gru_seq2vec_pallas(x_k, lengths, tile_max, h0,
                             (wih_p, whh_p, bgx, bhn),
                             tile_n=tile_n, est_bytes=est_bytes,
                             vmem_capacity=capacity)
    # output is 2D => reshape(inputs[0].size()[:2] + output.size()[1:])
    return out[:N, :H].reshape(B, G, H)


# ----------------------------------------------------------------------------
# Pure-JAX f32 reference (same GRU math) for a correctness check
# ----------------------------------------------------------------------------
def _reference(x, params, mask, hidden_state):
    B, G, T, D = x.shape
    w_ih, w_hh, b_ih, b_hh = [p.astype(jnp.float32) for p in params]
    H = w_hh.shape[1]
    N = B * G
    xf = x.reshape(N, T, D).astype(jnp.float32)
    mf = (jnp.ones((N, T), jnp.float32) if mask is None
          else mask.reshape(N, T).astype(jnp.float32))
    h = (jnp.zeros((N, H), jnp.float32) if hidden_state is None
         else hidden_state.reshape(-1, N, H)[0].astype(jnp.float32))

    def step(h, inp):
        x_t, m_t = inp
        gx = x_t @ w_ih.T + b_ih
        gh = h @ w_hh.T + b_hh
        r = jax.nn.sigmoid(gx[:, :H] + gh[:, :H])
        z = jax.nn.sigmoid(gx[:, H:2 * H] + gh[:, H:2 * H])
        n = jnp.tanh(gx[:, 2 * H:] + r * gh[:, 2 * H:])
        h_new = (1.0 - z) * n + z * h
        h = jnp.where(m_t[:, None] > 0, h_new, h)
        return h, None

    h, _ = lax.scan(step, h, (jnp.transpose(xf, (1, 0, 2)),
                              jnp.transpose(mf, (1, 0))))
    return h.reshape(B, G, H)


if __name__ == "__main__":
    # Module-consistent small shapes: batch=2, group(time-distributed)=4,
    # input_dim=16, hidden=32, num_layers=1.
    B, G, D, H = 2, 4, 16, 32

    key = jax.random.PRNGKey(0)
    (k_x, k_len, k_h, k_wih, k_whh, k_bih, k_bhh,
     k_x2, k_len2) = jax.random.split(key, 9)

    # PyTorch-layout GRU parameters (uniform init), gate order [r, z, n]
    scale = 1.0 / jnp.sqrt(H)
    w_ih = jax.random.uniform(k_wih, (3 * H, D), minval=-scale, maxval=scale,
                              dtype=jnp.float32)
    w_hh = jax.random.uniform(k_whh, (3 * H, H), minval=-scale, maxval=scale,
                              dtype=jnp.float32)
    b_ih = jax.random.uniform(k_bih, (3 * H,), minval=-scale, maxval=scale,
                              dtype=jnp.float32)
    b_hh = jax.random.uniform(k_bhh, (3 * H,), minval=-scale, maxval=scale,
                              dtype=jnp.float32)
    params = (w_ih, w_hh, b_ih, b_hh)

    # ---- Case 1: short sequences (static-unroll path) with a hidden state.
    T = 8
    x = jax.random.normal(k_x, (B, G, T, D), dtype=jnp.float32)
    lengths = jax.random.randint(k_len, (B, G), 1, T + 1)
    mask = (jnp.arange(T)[None, None, :] < lengths[:, :, None]).astype(jnp.float32)
    hidden_state = jax.random.normal(k_h, (1, B, G, H), dtype=jnp.float32) * 0.1

    out = time_distributed_seq2vec_rnn_chain(x, params, mask=mask,
                                             hidden_state=hidden_state)
    out = jax.block_until_ready(out)
    ref = _reference(x, params, mask, hidden_state)
    assert out.shape == (B, G, H)
    # bf16 x / W_hh / gx scratch on the recurrent path -> bf16-level tolerance
    assert jnp.allclose(out, ref, atol=3e-2, rtol=3e-2), float(
        jnp.max(jnp.abs(out - ref)))

    # ---- Case 2: longer ragged sequences (max-length-bounded dynamic loop),
    # hidden_state=None path (zero state created in-kernel).
    T2 = 24
    x2 = jax.random.normal(k_x2, (B, G, T2, D), dtype=jnp.float32)
    lengths2 = jax.random.randint(k_len2, (B, G), 1, T2 + 1)
    mask2 = (jnp.arange(T2)[None, None, :] < lengths2[:, :, None]).astype(jnp.float32)

    out2 = time_distributed_seq2vec_rnn_chain(x2, params, mask=mask2,
                                              hidden_state=None)
    out2 = jax.block_until_ready(out2)
    ref2 = _reference(x2, params, mask2, None)
    assert out2.shape == (B, G, H)
    assert jnp.allclose(out2, ref2, atol=5e-2, rtol=5e-2), float(
        jnp.max(jnp.abs(out2 - ref2)))

    print("KERNEL_OK")
</pallas_src>

<mosaic_0001>
module attributes {stable_mosaic.version = 11 : i64} {
  func.func @_gru_seq2vec_kernel(%arg0: i32, %arg1: memref<1xi32, #tpu.memory_space<smem>>, %arg2: memref<16x1xi32, #tpu.memory_space<vmem>>, %arg3: memref<8x16x16xbf16, #tpu.memory_space<vmem>>, %arg4: memref<16x384xbf16, #tpu.memory_space<vmem>>, %arg5: memref<128x384xbf16, #tpu.memory_space<vmem>>, %arg6: memref<1x384xf32, #tpu.memory_space<vmem>>, %arg7: memref<1x128xf32, #tpu.memory_space<vmem>>, %arg8: memref<16x128xf32, #tpu.memory_space<vmem>>, %arg9: memref<16x128xf32, #tpu.memory_space<vmem>>, %arg10: memref<8x16x384xbf16, #tpu.memory_space<vmem>>) attributes {dimension_semantics = [#tpu.dimension_semantics<parallel>], iteration_bounds = array<i64: 1>, scalar_prefetch = 1 : i64, scratch_operands = 1 : i64, tpu.core_type = #tpu.core_type<tc>, window_params = [{transform_indices = @transform_0, window_bounds = array<i64: 16, 1>}, {transform_indices = @transform_1, window_bounds = array<i64: 8, 16, 16>}, {pipeline_mode = #tpu.pipeline_mode<synchronous>, transform_indices = @transform_2, window_bounds = array<i64: 16, 384>}, {pipeline_mode = #tpu.pipeline_mode<synchronous>, transform_indices = @transform_3, window_bounds = array<i64: 128, 384>}, {pipeline_mode = #tpu.pipeline_mode<synchronous>, transform_indices = @transform_4, window_bounds = array<i64: 1, 384>}, {pipeline_mode = #tpu.pipeline_mode<synchronous>, transform_indices = @transform_5, window_bounds = array<i64: 1, 128>}, {transform_indices = @transform_6, window_bounds = array<i64: 16, 128>}, {transform_indices = @transform_7, window_bounds = array<i64: 16, 128>}]} {
    %c0_i32 = arith.constant 0 : i32
    %c2_i32 = arith.constant 2 : i32
    %0 = arith.addi %c0_i32, %c2_i32 : i32
    %c1_i32 = arith.constant 1 : i32
    scf.for %arg11 = %c0_i32 to %0 step %c1_i32  : i32 {
      %c1_i32_89 = arith.constant 1 : i32
      %324 = arith.muli %arg11, %c1_i32_89 : i32
      %c0_i32_90 = arith.constant 0 : i32
      %325 = arith.addi %c0_i32_90, %324 : i32
      %c4_i32_91 = arith.constant 4 : i32
      %326 = arith.muli %325, %c4_i32_91 : i32
      %327 = tpu.assume_multiple %326, 4 : i32
      %328 = arith.index_cast %327 : i32 to index
      %c0_92 = arith.constant 0 : index
      %c0_93 = arith.constant 0 : index
      %329 = vector.load %arg3[%328, %c0_92, %c0_93] : memref<8x16x16xbf16, #tpu.memory_space<vmem>>, vector<4x16x16xbf16>
      %330 = vector.shape_cast %329 : vector<4x16x16xbf16> to vector<64x16xbf16>
      %c0_94 = arith.constant 0 : index
      %c0_95 = arith.constant 0 : index
      %331 = vector.load %arg4[%c0_94, %c0_95] : memref<16x384xbf16, #tpu.memory_space<vmem>>, vector<16x384xbf16>
      %cst_96 = arith.constant dense<0.000000e+00> : vector<64x384xf32>
      %332 = tpu.matmul %330, %331, %cst_96 {dimension_numbers = #tpu.dot_dimension_numbers<[1], [0], [0], [1], [0, 0, 1, 1], [], []>} : vector<64x16xbf16>, vector<16x384xbf16>, vector<64x384xf32> -> vector<64x384xf32>
      %c0_97 = arith.constant 0 : index
      %c0_98 = arith.constant 0 : index
      %333 = vector.load %arg6[%c0_97, %c0_98] : memref<1x384xf32, #tpu.memory_space<vmem>>, vector<1x384xf32>
      %334 = vector.broadcast %333 : vector<1x384xf32> to vector<64x384xf32>
      %335 = arith.addf %332, %334 : vector<64x384xf32>
      %336 = vector.shape_cast %335 : vector<64x384xf32> to vector<4x16x384xf32>
      %337 = arith.truncf %336 : vector<4x16x384xf32> to vector<4x16x384xbf16>
      %338 = arith.index_cast %327 : i32 to index
      %c0_99 = arith.constant 0 : index
      %c0_100 = arith.constant 0 : index
      %339 = vector.load %arg10[%338, %c0_99, %c0_100] : memref<8x16x384xbf16, #tpu.memory_space<vmem>>, vector<4x16x384xbf16>
      tpu.vector_store %arg10[%338, %c0_99, %c0_100], %337 {strides = array<i32>} : memref<8x16x384xbf16, #tpu.memory_space<vmem>>, vector<4x16x384xbf16>,
    }
    %c2_i32_0 = arith.constant 2 : i32
    %c0 = arith.constant 0 : index
    %c0_1 = arith.constant 0 : index
    %1 = vector.load %arg2[%c0, %c0_1] : memref<16x1xi32, #tpu.memory_space<vmem>>, vector<16x1xi32>
    %c0_2 = arith.constant 0 : index
    %c0_3 = arith.constant 0 : index
    %2 = vector.load %arg8[%c0_2, %c0_3] : memref<16x128xf32, #tpu.memory_space<vmem>>, vector<16x128xf32>
    %c0_4 = arith.constant 0 : index
    %c0_5 = arith.constant 0 : index
    %c0_6 = arith.constant 0 : index
    %3 = vector.load %arg10[%c0_4, %c0_5, %c0_6] : memref<8x16x384xbf16, #tpu.memory_space<vmem>>, vector<1x16x384xbf16>
    %4 = vector.shape_cast %3 : vector<1x16x384xbf16> to vector<16x384xbf16>
    %5 = arith.extf %4 : vector<16x384xbf16> to vector<16x384xf32>
    %6 = arith.truncf %2 : vector<16x128xf32> to vector<16x128xbf16>
    %c0_7 = arith.constant 0 : index
    %c0_8 = arith.constant 0 : index
    %7 = vector.load %arg5[%c0_7, %c0_8] : memref<128x384xbf16, #tpu.memory_space<vmem>>, vector<128x384xbf16>
    %cst = arith.constant dense<0.000000e+00> : vector<16x384xf32>
    %8 = tpu.matmul %6, %7, %cst {dimension_numbers = #tpu.dot_dimension_numbers<[1], [0], [0], [1], [0, 0, 1, 1], [], []>} : vector<16x128xbf16>, vector<128x384xbf16>, vector<16x384xf32> -> vector<16x384xf32>
    %9 = vector.extract_strided_slice %5 {offsets = [0, 0], sizes = [16, 128], strides = [1, 1]} : vector<16x384xf32> to vector<16x128xf32>
    %10 = vector.extract_strided_slice %8 {offsets = [0, 0], sizes = [16, 128], strides = [1, 1]} : vector<16x384xf32> to vector<16x128xf32>
    %11 = arith.addf %9, %10 : vector<16x128xf32>
    %12 = arith.negf %11 : vector<16x128xf32>
    %13 = math.exp %12 : vector<16x128xf32>
    %cst_9 = arith.constant 1.000000e+00 : f32
    %14 = vector.broadcast %cst_9 : f32 to vector<16x128xf32>
    %15 = arith.addf %14, %13 : vector<16x128xf32>
    %16 = arith.divf %14, %15 : vector<16x128xf32>
    %17 = vector.extract_strided_slice %5 {offsets = [0, 128], sizes = [16, 128], strides = [1, 1]} : vector<16x384xf32> to vector<16x128xf32>
    %18 = vector.extract_strided_slice %8 {offsets = [0, 128], sizes = [16, 128], strides = [1, 1]} : vector<16x384xf32> to vector<16x128xf32>
    %19 = arith.addf %17, %18 : vector<16x128xf32>
    %20 = arith.negf %19 : vector<16x128xf32>
    %21 = math.exp %20 : vector<16x128xf32>
    %cst_10 = arith.constant 1.000000e+00 : f32
    %22 = vector.broadcast %cst_10 : f32 to vector<16x128xf32>
    %23 = arith.addf %22, %21 : vector<16x128xf32>
    %24 = arith.divf %22, %23 : vector<16x128xf32>
    %25 = vector.extract_strided_slice %5 {offsets = [0, 256], sizes = [16, 128], strides = [1, 1]} : vector<16x384xf32> to vector<16x128xf32>
    %26 = vector.extract_strided_slice %8 {offsets = [0, 256], sizes = [16, 128], strides = [1, 1]} : vector<16x384xf32> to vector<16x128xf32>
    %c0_11 = arith.constant 0 : index
    %c0_12 = arith.constant 0 : index
    %27 = vector.load %arg7[%c0_11, %c0_12] : memref<1x128xf32, #tpu.memory_space<vmem>>, vector<1x128xf32>
    %28 = vector.broadcast %27 : vector<1x128xf32> to vector<16x128xf32>
    %29 = arith.addf %26, %28 : vector<16x128xf32>
    %30 = arith.mulf %16, %29 : vector<16x128xf32>
    %31 = arith.addf %25, %30 : vector<16x128xf32>
    %32 = math.tanh %31 : vector<16x128xf32>
    %cst_13 = arith.constant 1.000000e+00 : f32
    %33 = vector.broadcast %cst_13 : f32 to vector<16x128xf32>
    %34 = arith.subf %33, %24 : vector<16x128xf32>
    %35 = arith.mulf %34, %32 : vector<16x128xf32>
    %36 = arith.mulf %24, %2 : vector<16x128xf32>
    %37 = arith.addf %35, %36 : vector<16x128xf32>
    %c0_i32_14 = arith.constant 0 : i32
    %38 = vector.broadcast %c0_i32_14 : i32 to vector<16x1xi32>
    %39 = arith.cmpi sgt, %1, %38 : vector<16x1xi32>
    %40 = vector.shape_cast %39 : vector<16x1xi1> to vector<16x1xi1>
    %41 = vector.broadcast %40 : vector<16x1xi1> to vector<16x128xi1>
    %42 = arith.select %41, %37, %2 : vector<16x128xi1>, vector<16x128xf32>
    %c1 = arith.constant 1 : index
    %c0_15 = arith.constant 0 : index
    %c0_16 = arith.constant 0 : index
    %43 = vector.load %arg10[%c1, %c0_15, %c0_16] : memref<8x16x384xbf16, #tpu.memory_space<vmem>>, vector<1x16x384xbf16>
    %44 = vector.shape_cast %43 : vector<1x16x384xbf16> to vector<16x384xbf16>
    %45 = arith.extf %44 : vector<16x384xbf16> to vector<16x384xf32>
    %46 = arith.truncf %42 : vector<16x128xf32> to vector<16x128xbf16>
    %c0_17 = arith.constant 0 : index
    %c0_18 = arith.constant 0 : index
    %47 = vector.load %arg5[%c0_17, %c0_18] : memref<128x384xbf16, #tpu.memory_space<vmem>>, vector<128x384xbf16>
    %cst_19 = arith.constant dense<0.000000e+00> : vector<16x384xf32>
    %48 = tpu.matmul %46, %47, %cst_19 {dimension_numbers = #tpu.dot_dimension_numbers<[1], [0], [0], [1], [0, 0, 1, 1], [], []>} : vector<16x128xbf16>, vector<128x384xbf16>, vector<16x384xf32> -> vector<16x384xf32>
    %49 = vector.extract_strided_slice %45 {offsets = [0, 0], sizes = [16, 128], strides = [1, 1]} : vector<16x384xf32> to vector<16x128xf32>
    %50 = vector.extract_strided_slice %48 {offsets = [0, 0], sizes = [16, 128], strides = [1, 1]} : vector<16x384xf32> to vector<16x128xf32>
    %51 = arith.addf %49, %50 : vector<16x128xf32>
    %52 = arith.negf %51 : vector<16x128xf32>
    %53 = math.exp %52 : vector<16x128xf32>
    %cst_20 = arith.constant 1.000000e+00 : f32
    %54 = vector.broadcast %cst_20 : f32 to vector<16x128xf32>
    %55 = arith.addf %54, %53 : vector<16x128xf32>
    %56 = arith.divf %54, %55 : vector<16x128xf32>
    %57 = vector.extract_strided_slice %45 {offsets = [0, 128], sizes = [16, 128], strides = [1, 1]} : vector<16x384xf32> to vector<16x128xf32>
    %58 = vector.extract_strided_slice %48 {offsets = [0, 128], sizes = [16, 128], strides = [1, 1]} : vector<16x384xf32> to vector<16x128xf32>
    %59 = arith.addf %57, %58 : vector<16x128xf32>
    %60 = arith.negf %59 : vector<16x128xf32>
    %61 = math.exp %60 : vector<16x128xf32>
    %cst_21 = arith.constant 1.000000e+00 : f32
    %62 = vector.broadcast %cst_21 : f32 to vector<16x128xf32>
    %63 = arith.addf %62, %61 : vector<16x128xf32>
    %64 = arith.divf %62, %63 : vector<16x128xf32>
    %65 = vector.extract_strided_slice %45 {offsets = [0, 256], sizes = [16, 128], strides = [1, 1]} : vector<16x384xf32> to vector<16x128xf32>
    %66 = vector.extract_strided_slice %48 {offsets = [0, 256], sizes = [16, 128], strides = [1, 1]} : vector<16x384xf32> to vector<16x128xf32>
    %c0_22 = arith.constant 0 : index
    %c0_23 = arith.constant 0 : index
    %67 = vector.load %arg7[%c0_22, %c0_23] : memref<1x128xf32, #tpu.memory_space<vmem>>, vector<1x128xf32>
    %68 = vector.broadcast %67 : vector<1x128xf32> to vector<16x128xf32>
    %69 = arith.addf %66, %68 : vector<16x128xf32>
    %70 = arith.mulf %56, %69 : vector<16x128xf32>
    %71 = arith.addf %65, %70 : vector<16x128xf32>
    %72 = math.tanh %71 : vector<16x128xf32>
    %cst_24 = arith.constant 1.000000e+00 : f32
    %73 = vector.broadcast %cst_24 : f32 to vector<16x128xf32>
    %74 = arith.subf %73, %64 : vector<16x128xf32>
    %75 = arith.mulf %74, %72 : vector<16x128xf32>
    %76 = arith.mulf %64, %42 : vector<16x128xf32>
    %77 = arith.addf %75, %76 : vector<16x128xf32>
    %c1_i32_25 = arith.constant 1 : i32
    %78 = vector.broadcast %c1_i32_25 : i32 to vector<16x1xi32>
    %79 = arith.cmpi sgt, %1, %78 : vector<16x1xi32>
    %80 = vector.shape_cast %79 : vector<16x1xi1> to vector<16x1xi1>
    %81 = vector.broadcast %80 : vector<16x1xi1> to vector<16x128xi1>
    %82 = arith.select %81, %77, %42 : vector<16x128xi1>, vector<16x128xf32>
    %c2 = arith.constant 2 : index
    %c0_26 = arith.constant 0 : index
    %c0_27 = arith.constant 0 : index
    %83 = vector.load %arg10[%c2, %c0_26, %c0_27] : memref<8x16x384xbf16, #tpu.memory_space<vmem>>, vector<1x16x384xbf16>
    %84 = vector.shape_cast %83 : vector<1x16x384xbf16> to vector<16x384xbf16>
    %85 = arith.extf %84 : vector<16x384xbf16> to vector<16x384xf32>
    %86 = arith.truncf %82 : vector<16x128xf32> to vector<16x128xbf16>
    %c0_28 = arith.constant 0 : index
    %c0_29 = arith.constant 0 : index
    %87 = vector.load %arg5[%c0_28, %c0_29] : memref<128x384xbf16, #tpu.memory_space<vmem>>, vector<128x384xbf16>
    %cst_30 = arith.constant dense<0.000000e+00> : vector<16x384xf32>
    %88 = tpu.matmul %86, %87, %cst_30 {dimension_numbers = #tpu.dot_dimension_numbers<[1], [0], [0], [1], [0, 0, 1, 1], [], []>} : vector<16x128xbf16>, vector<128x384xbf16>, vector<16x384xf32> -> vector<16x384xf32>
    %89 = vector.extract_strided_slice %85 {offsets = [0, 0], sizes = [16, 128], strides = [1, 1]} : vector<16x384xf32> to vector<16x128xf32>
    %90 = vector.extract_strided_slice %88 {offsets = [0, 0], sizes = [16, 128], strides = [1, 1]} : vector<16x384xf32> to vector<16x128xf32>
    %91 = arith.addf %89, %90 : vector<16x128xf32>
    %92 = arith.negf %91 : vector<16x128xf32>
    %93 = math.exp %92 : vector<16x128xf32>
    %cst_31 = arith.constant 1.000000e+00 : f32
    %94 = vector.broadcast %cst_31 : f32 to vector<16x128xf32>
    %95 = arith.addf %94, %93 : vector<16x128xf32>
    %96 = arith.divf %94, %95 : vector<16x128xf32>
    %97 = vector.extract_strided_slice %85 {offsets = [0, 128], sizes = [16, 128], strides = [1, 1]} : vector<16x384xf32> to vector<16x128xf32>
    %98 = vector.extract_strided_slice %88 {offsets = [0, 128], sizes = [16, 128], strides = [1, 1]} : vector<16x384xf32> to vector<16x128xf32>
    %99 = arith.addf %97, %98 : vector<16x128xf32>
    %100 = arith.negf %99 : vector<16x128xf32>
    %101 = math.exp %100 : vector<16x128xf32>
    %cst_32 = arith.constant 1.000000e+00 : f32
    %102 = vector.broadcast %cst_32 : f32 to vector<16x128xf32>
    %103 = arith.addf %102, %101 : vector<16x128xf32>
    %104 = arith.divf %102, %103 : vector<16x128xf32>
    %105 = vector.extract_strided_slice %85 {offsets = [0, 256], sizes = [16, 128], strides = [1, 1]} : vector<16x384xf32> to vector<16x128xf32>
    %106 = vector.extract_strided_slice %88 {offsets = [0, 256], sizes = [16, 128], strides = [1, 1]} : vector<16x384xf32> to vector<16x128xf32>
    %c0_33 = arith.constant 0 : index
    %c0_34 = arith.constant 0 : index
    %107 = vector.load %arg7[%c0_33, %c0_34] : memref<1x128xf32, #tpu.memory_space<vmem>>, vector<1x128xf32>
    %108 = vector.broadcast %107 : vector<1x128xf32> to vector<16x128xf32>
    %109 = arith.addf %106, %108 : vector<16x128xf32>
    %110 = arith.mulf %96, %109 : vector<16x128xf32>
    %111 = arith.addf %105, %110 : vector<16x128xf32>
    %112 = math.tanh %111 : vector<16x128xf32>
    %cst_35 = arith.constant 1.000000e+00 : f32
    %113 = vector.broadcast %cst_35 : f32 to vector<16x128xf32>
    %114 = arith.subf %113, %104 : vector<16x128xf32>
    %115 = arith.mulf %114, %112 : vector<16x128xf32>
    %116 = arith.mulf %104, %82 : vector<16x128xf32>
    %117 = arith.addf %115, %116 : vector<16x128xf32>
    %c2_i32_36 = arith.constant 2 : i32
    %118 = vector.broadcast %c2_i32_36 : i32 to vector<16x1xi32>
    %119 = arith.cmpi sgt, %1, %118 : vector<16x1xi32>
    %120 = vector.shape_cast %119 : vector<16x1xi1> to vector<16x1xi1>
    %121 = vector.broadcast %120 : vector<16x1xi1> to vector<16x128xi1>
    %122 = arith.select %121, %117, %82 : vector<16x128xi1>, vector<16x128xf32>
    %c3 = arith.constant 3 : index
    %c0_37 = arith.constant 0 : index
    %c0_38 = arith.constant 0 : index
    %123 = vector.load %arg10[%c3, %c0_37, %c0_38] : memref<8x16x384xbf16, #tpu.memory_space<vmem>>, vector<1x16x384xbf16>
    %124 = vector.shape_cast %123 : vector<1x16x384xbf16> to vector<16x384xbf16>
    %125 = arith.extf %124 : vector<16x384xbf16> to vector<16x384xf32>
    %126 = arith.truncf %122 : vector<16x128xf32> to vector<16x128xbf16>
    %c0_39 = arith.constant 0 : index
    %c0_40 = arith.constant 0 : index
    %127 = vector.load %arg5[%c0_39, %c0_40] : memref<128x384xbf16, #tpu.memory_space<vmem>>, vector<128x384xbf16>
    %cst_41 = arith.constant dense<0.000000e+00> : vector<16x384xf32>
    %128 = tpu.matmul %126, %127, %cst_41 {dimension_numbers = #tpu.dot_dimension_numbers<[1], [0], [0], [1], [0, 0, 1, 1], [], []>} : vector<16x128xbf16>, vector<128x384xbf16>, vector<16x384xf32> -> vector<16x384xf32>
    %129 = vector.extract_strided_slice %125 {offsets = [0, 0], sizes = [16, 128], strides = [1, 1]} : vector<16x384xf32> to vector<16x128xf32>
    %130 = vector.extract_strided_slice %128 {offsets = [0, 0], sizes = [16, 128], strides = [1, 1]} : vector<16x384xf32> to vector<16x128xf32>
    %131 = arith.addf %129, %130 : vector<16x128xf32>
    %132 = arith.negf %131 : vector<16x128xf32>
    %133 = math.exp %132 : vector<16x128xf32>
    %cst_42 = arith.constant 1.000000e+00 : f32
    %134 = vector.broadcast %cst_42 : f32 to vector<16x128xf32>
    %135 = arith.addf %134, %133 : vector<16x128xf32>
    %136 = arith.divf %134, %135 : vector<16x128xf32>
    %137 = vector.extract_strided_slice %125 {offsets = [0, 128], sizes = [16, 128], strides = [1, 1]} : vector<16x384xf32> to vector<16x128xf32>
    %138 = vector.extract_strided_slice %128 {offsets = [0, 128], sizes = [16, 128], strides = [1, 1]} : vector<16x384xf32> to vector<16x128xf32>
    %139 = arith.addf %137, %138 : vector<16x128xf32>
    %140 = arith.negf %139 : vector<16x128xf32>
    %141 = math.exp %140 : vector<16x128xf32>
    %cst_43 = arith.constant 1.000000e+00 : f32
    %142 = vector.broadcast %cst_43 : f32 to vector<16x128xf32>
    %143 = arith.addf %142, %141 : vector<16x128xf32>
    %144 = arith.divf %142, %143 : vector<16x128xf32>
    %145 = vector.extract_strided_slice %125 {offsets = [0, 256], sizes = [16, 128], strides = [1, 1]} : vector<16x384xf32> to vector<16x128xf32>
    %146 = vector.extract_strided_slice %128 {offsets = [0, 256], sizes = [16, 128], strides = [1, 1]} : vector<16x384xf32> to vector<16x128xf32>
    %c0_44 = arith.constant 0 : index
    %c0_45 = arith.constant 0 : index
    %147 = vector.load %arg7[%c0_44, %c0_45] : memref<1x128xf32, #tpu.memory_space<vmem>>, vector<1x128xf32>
    %148 = vector.broadcast %147 : vector<1x128xf32> to vector<16x128xf32>
    %149 = arith.addf %146, %148 : vector<16x128xf32>
    %150 = arith.mulf %136, %149 : vector<16x128xf32>
    %151 = arith.addf %145, %150 : vector<16x128xf32>
    %152 = math.tanh %151 : vector<16x128xf32>
    %cst_46 = arith.constant 1.000000e+00 : f32
    %153 = vector.broadcast %cst_46 : f32 to vector<16x128xf32>
    %154 = arith.subf %153, %144 : vector<16x128xf32>
    %155 = arith.mulf %154, %152 : vector<16x128xf32>
    %156 = arith.mulf %144, %122 : vector<16x128xf32>
    %157 = arith.addf %155, %156 : vector<16x128xf32>
    %c3_i32 = arith.constant 3 : i32
    %158 = vector.broadcast %c3_i32 : i32 to vector<16x1xi32>
    %159 = arith.cmpi sgt, %1, %158 : vector<16x1xi32>
    %160 = vector.shape_cast %159 : vector<16x1xi1> to vector<16x1xi1>
    %161 = vector.broadcast %160 : vector<16x1xi1> to vector<16x128xi1>
    %162 = arith.select %161, %157, %122 : vector<16x128xi1>, vector<16x128xf32>
    %c4 = arith.constant 4 : index
    %c0_47 = arith.constant 0 : index
    %c0_48 = arith.constant 0 : index
    %163 = vector.load %arg10[%c4, %c0_47, %c0_48] : memref<8x16x384xbf16, #tpu.memory_space<vmem>>, vector<1x16x384xbf16>
    %164 = vector.shape_cast %163 : vector<1x16x384xbf16> to vector<16x384xbf16>
    %165 = arith.extf %164 : vector<16x384xbf16> to vector<16x384xf32>
    %166 = arith.truncf %162 : vector<16x128xf32> to vector<16x128xbf16>
    %c0_49 = arith.constant 0 : index
    %c0_50 = arith.constant 0 : index
    %167 = vector.load %arg5[%c0_49, %c0_50] : memref<128x384xbf16, #tpu.memory_space<vmem>>, vector<128x384xbf16>
    %cst_51 = arith.constant dense<0.000000e+00> : vector<16x384xf32>
    %168 = tpu.matmul %166, %167, %cst_51 {dimension_numbers = #tpu.dot_dimension_numbers<[1], [0], [0], [1], [0, 0, 1, 1], [], []>} : vector<16x128xbf16>, vector<128x384xbf16>, vector<16x384xf32> -> vector<16x384xf32>
    %169 = vector.extract_strided_slice %165 {offsets = [0, 0], sizes = [16, 128], strides = [1, 1]} : vector<16x384xf32> to vector<16x128xf32>
    %170 = vector.extract_strided_slice %168 {offsets = [0, 0], sizes = [16, 128], strides = [1, 1]} : vector<16x384xf32> to vector<16x128xf32>
    %171 = arith.addf %169, %170 : vector<16x128xf32>
    %172 = arith.negf %171 : vector<16x128xf32>
    %173 = math.exp %172 : vector<16x128xf32>
    %cst_52 = arith.constant 1.000000e+00 : f32
    %174 = vector.broadcast %cst_52 : f32 to vector<16x128xf32>
    %175 = arith.addf %174, %173 : vector<16x128xf32>
    %176 = arith.divf %174, %175 : vector<16x128xf32>
    %177 = vector.extract_strided_slice %165 {offsets = [0, 128], sizes = [16, 128], strides = [1, 1]} : vector<16x384xf32> to vector<16x128xf32>
    %178 = vector.extract_strided_slice %168 {offsets = [0, 128], sizes = [16, 128], strides = [1, 1]} : vector<16x384xf32> to vector<16x128xf32>
    %179 = arith.addf %177, %178 : vector<16x128xf32>
    %180 = arith.negf %179 : vector<16x128xf32>
    %181 = math.exp %180 : vector<16x128xf32>
    %cst_53 = arith.constant 1.000000e+00 : f32
    %182 = vector.broadcast %cst_53 : f32 to vector<16x128xf32>
    %183 = arith.addf %182, %181 : vector<16x128xf32>
    %184 = arith.divf %182, %183 : vector<16x128xf32>
    %185 = vector.extract_strided_slice %165 {offsets = [0, 256], sizes = [16, 128], strides = [1, 1]} : vector<16x384xf32> to vector<16x128xf32>
    %186 = vector.extract_strided_slice %168 {offsets = [0, 256], sizes = [16, 128], strides = [1, 1]} : vector<16x384xf32> to vector<16x128xf32>
    %c0_54 = arith.constant 0 : index
    %c0_55 = arith.constant 0 : index
    %187 = vector.load %arg7[%c0_54, %c0_55] : memref<1x128xf32, #tpu.memory_space<vmem>>, vector<1x128xf32>
    %188 = vector.broadcast %187 : vector<1x128xf32> to vector<16x128xf32>
    %189 = arith.addf %186, %188 : vector<16x128xf32>
    %190 = arith.mulf %176, %189 : vector<16x128xf32>
    %191 = arith.addf %185, %190 : vector<16x128xf32>
    %192 = math.tanh %191 : vector<16x128xf32>
    %cst_56 = arith.constant 1.000000e+00 : f32
    %193 = vector.broadcast %cst_56 : f32 to vector<16x128xf32>
    %194 = arith.subf %193, %184 : vector<16x128xf32>
    %195 = arith.mulf %194, %192 : vector<16x128xf32>
    %196 = arith.mulf %184, %162 : vector<16x128xf32>
    %197 = arith.addf %195, %196 : vector<16x128xf32>
    %c4_i32 = arith.constant 4 : i32
    %198 = vector.broadcast %c4_i32 : i32 to vector<16x1xi32>
    %199 = arith.cmpi sgt, %1, %198 : vector<16x1xi32>
    %200 = vector.shape_cast %199 : vector<16x1xi1> to vector<16x1xi1>
    %201 = vector.broadcast %200 : vector<16x1xi1> to vector<16x128xi1>
    %202 = arith.select %201, %197, %162 : vector<16x128xi1>, vector<16x128xf32>
    %c5 = arith.constant 5 : index
    %c0_57 = arith.constant 0 : index
    %c0_58 = arith.constant 0 : index
    %203 = vector.load %arg10[%c5, %c0_57, %c0_58] : memref<8x16x384xbf16, #tpu.memory_space<vmem>>, vector<1x16x384xbf16>
    %204 = vector.shape_cast %203 : vector<1x16x384xbf16> to vector<16x384xbf16>
    %205 = arith.extf %204 : vector<16x384xbf16> to vector<16x384xf32>
    %206 = arith.truncf %202 : vector<16x128xf32> to vector<16x128xbf16>
    %c0_59 = arith.constant 0 : index
    %c0_60 = arith.constant 0 : index
    %207 = vector.load %arg5[%c0_59, %c0_60] : memref<128x384xbf16, #tpu.memory_space<vmem>>, vector<128x384xbf16>
    %cst_61 = arith.constant dense<0.000000e+00> : vector<16x384xf32>
    %208 = tpu.matmul %206, %207, %cst_61 {dimension_numbers = #tpu.dot_dimension_numbers<[1], [0], [0], [1], [0, 0, 1, 1], [], []>} : vector<16x128xbf16>, vector<128x384xbf16>, vector<16x384xf32> -> vector<16x384xf32>
    %209 = vector.extract_strided_slice %205 {offsets = [0, 0], sizes = [16, 128], strides = [1, 1]} : vector<16x384xf32> to vector<16x128xf32>
    %210 = vector.extract_strided_slice %208 {offsets = [0, 0], sizes = [16, 128], strides = [1, 1]} : vector<16x384xf32> to vector<16x128xf32>
    %211 = arith.addf %209, %210 : vector<16x128xf32>
    %212 = arith.negf %211 : vector<16x128xf32>
    %213 = math.exp %212 : vector<16x128xf32>
    %cst_62 = arith.constant 1.000000e+00 : f32
    %214 = vector.broadcast %cst_62 : f32 to vector<16x128xf32>
    %215 = arith.addf %214, %213 : vector<16x128xf32>
    %216 = arith.divf %214, %215 : vector<16x128xf32>
    %217 = vector.extract_strided_slice %205 {offsets = [0, 128], sizes = [16, 128], strides = [1, 1]} : vector<16x384xf32> to vector<16x128xf32>
    %218 = vector.extract_strided_slice %208 {offsets = [0, 128], sizes = [16, 128], strides = [1, 1]} : vector<16x384xf32> to vector<16x128xf32>
    %219 = arith.addf %217, %218 : vector<16x128xf32>
    %220 = arith.negf %219 : vector<16x128xf32>
    %221 = math.exp %220 : vector<16x128xf32>
    %cst_63 = arith.constant 1.000000e+00 : f32
    %222 = vector.broadcast %cst_63 : f32 to vector<16x128xf32>
    %223 = arith.addf %222, %221 : vector<16x128xf32>
    %224 = arith.divf %222, %223 : vector<16x128xf32>
    %225 = vector.extract_strided_slice %205 {offsets = [0, 256], sizes = [16, 128], strides = [1, 1]} : vector<16x384xf32> to vector<16x128xf32>
    %226 = vector.extract_strided_slice %208 {offsets = [0, 256], sizes = [16, 128], strides = [1, 1]} : vector<16x384xf32> to vector<16x128xf32>
    %c0_64 = arith.constant 0 : index
    %c0_65 = arith.constant 0 : index
    %227 = vector.load %arg7[%c0_64, %c0_65] : memref<1x128xf32, #tpu.memory_space<vmem>>, vector<1x128xf32>
    %228 = vector.broadcast %227 : vector<1x128xf32> to vector<16x128xf32>
    %229 = arith.addf %226, %228 : vector<16x128xf32>
    %230 = arith.mulf %216, %229 : vector<16x128xf32>
    %231 = arith.addf %225, %230 : vector<16x128xf32>
    %232 = math.tanh %231 : vector<16x128xf32>
    %cst_66 = arith.constant 1.000000e+00 : f32
    %233 = vector.broadcast %cst_66 : f32 to vector<16x128xf32>
    %234 = arith.subf %233, %224 : vector<16x128xf32>
    %235 = arith.mulf %234, %232 : vector<16x128xf32>
    %236 = arith.mulf %224, %202 : vector<16x128xf32>
    %237 = arith.addf %235, %236 : vector<16x128xf32>
    %c5_i32 = arith.constant 5 : i32
    %238 = vector.broadcast %c5_i32 : i32 to vector<16x1xi32>
    %239 = arith.cmpi sgt, %1, %238 : vector<16x1xi32>
    %240 = vector.shape_cast %239 : vector<16x1xi1> to vector<16x1xi1>
    %241 = vector.broadcast %240 : vector<16x1xi1> to vector<16x128xi1>
    %242 = arith.select %241, %237, %202 : vector<16x128xi1>, vector<16x128xf32>
    %c6 = arith.constant 6 : index
    %c0_67 = arith.constant 0 : index
    %c0_68 = arith.constant 0 : index
    %243 = vector.load %arg10[%c6, %c0_67, %c0_68] : memref<8x16x384xbf16, #tpu.memory_space<vmem>>, vector<1x16x384xbf16>
    %244 = vector.shape_cast %243 : vector<1x16x384xbf16> to vector<16x384xbf16>
    %245 = arith.extf %244 : vector<16x384xbf16> to vector<16x384xf32>
    %246 = arith.truncf %242 : vector<16x128xf32> to vector<16x128xbf16>
    %c0_69 = arith.constant 0 : index
    %c0_70 = arith.constant 0 : index
    %247 = vector.load %arg5[%c0_69, %c0_70] : memref<128x384xbf16, #tpu.memory_space<vmem>>, vector<128x384xbf16>
    %cst_71 = arith.constant dense<0.000000e+00> : vector<16x384xf32>
    %248 = tpu.matmul %246, %247, %cst_71 {dimension_numbers = #tpu.dot_dimension_numbers<[1], [0], [0], [1], [0, 0, 1, 1], [], []>} : vector<16x128xbf16>, vector<128x384xbf16>, vector<16x384xf32> -> vector<16x384xf32>
    %249 = vector.extract_strided_slice %245 {offsets = [0, 0], sizes = [16, 128], strides = [1, 1]} : vector<16x384xf32> to vector<16x128xf32>
    %250 = vector.extract_strided_slice %248 {offsets = [0, 0], sizes = [16, 128], strides = [1, 1]} : vector<16x384xf32> to vector<16x128xf32>
    %251 = arith.addf %249, %250 : vector<16x128xf32>
    %252 = arith.negf %251 : vector<16x128xf32>
    %253 = math.exp %252 : vector<16x128xf32>
    %cst_72 = arith.constant 1.000000e+00 : f32
    %254 = vector.broadcast %cst_72 : f32 to vector<16x128xf32>
    %255 = arith.addf %254, %253 : vector<16x128xf32>
    %256 = arith.divf %254, %255 : vector<16x128xf32>
    %257 = vector.extract_strided_slice %245 {offsets = [0, 128], sizes = [16, 128], strides = [1, 1]} : vector<16x384xf32> to vector<16x128xf32>
    %258 = vector.extract_strided_slice %248 {offsets = [0, 128], sizes = [16, 128], strides = [1, 1]} : vector<16x384xf32> to vector<16x128xf32>
    %259 = arith.addf %257, %258 : vector<16x128xf32>
    %260 = arith.negf %259 : vector<16x128xf32>
    %261 = math.exp %260 : vector<16x128xf32>
    %cst_73 = arith.constant 1.000000e+00 : f32
    %262 = vector.broadcast %cst_73 : f32 to vector<16x128xf32>
    %263 = arith.addf %262, %261 : vector<16x128xf32>
    %264 = arith.divf %262, %263 : vector<16x128xf32>
    %265 = vector.extract_strided_slice %245 {offsets = [0, 256], sizes = [16, 128], strides = [1, 1]} : vector<16x384xf32> to vector<16x128xf32>
    %266 = vector.extract_strided_slice %248 {offsets = [0, 256], sizes = [16, 128], strides = [1, 1]} : vector<16x384xf32> to vector<16x128xf32>
    %c0_74 = arith.constant 0 : index
    %c0_75 = arith.constant 0 : index
    %267 = vector.load %arg7[%c0_74, %c0_75] : memref<1x128xf32, #tpu.memory_space<vmem>>, vector<1x128xf32>
    %268 = vector.broadcast %267 : vector<1x128xf32> to vector<16x128xf32>
    %269 = arith.addf %266, %268 : vector<16x128xf32>
    %270 = arith.mulf %256, %269 : vector<16x128xf32>
    %271 = arith.addf %265, %270 : vector<16x128xf32>
    %272 = math.tanh %271 : vector<16x128xf32>
    %cst_76 = arith.constant 1.000000e+00 : f32
    %273 = vector.broadcast %cst_76 : f32 to vector<16x128xf32>
    %274 = arith.subf %273, %264 : vector<16x128xf32>
    %275 = arith.mulf %274, %272 : vector<16x128xf32>
    %276 = arith.mulf %264, %242 : vector<16x128xf32>
    %277 = arith.addf %275, %276 : vector<16x128xf32>
    %c6_i32 = arith.constant 6 : i32
    %278 = vector.broadcast %c6_i32 : i32 to vector<16x1xi32>
    %279 = arith.cmpi sgt, %1, %278 : vector<16x1xi32>
    %280 = vector.shape_cast %279 : vector<16x1xi1> to vector<16x1xi1>
    %281 = vector.broadcast %280 : vector<16x1xi1> to vector<16x128xi1>
    %282 = arith.select %281, %277, %242 : vector<16x128xi1>, vector<16x128xf32>
    %c7 = arith.constant 7 : index
    %c0_77 = arith.constant 0 : index
    %c0_78 = arith.constant 0 : index
    %283 = vector.load %arg10[%c7, %c0_77, %c0_78] : memref<8x16x384xbf16, #tpu.memory_space<vmem>>, vector<1x16x384xbf16>
    %284 = vector.shape_cast %283 : vector<1x16x384xbf16> to vector<16x384xbf16>
    %285 = arith.extf %284 : vector<16x384xbf16> to vector<16x384xf32>
    %286 = arith.truncf %282 : vector<16x128xf32> to vector<16x128xbf16>
    %c0_79 = arith.constant 0 : index
    %c0_80 = arith.constant 0 : index
    %287 = vector.load %arg5[%c0_79, %c0_80] : memref<128x384xbf16, #tpu.memory_space<vmem>>, vector<128x384xbf16>
    %cst_81 = arith.constant dense<0.000000e+00> : vector<16x384xf32>
    %288 = tpu.matmul %286, %287, %cst_81 {dimension_numbers = #tpu.dot_dimension_numbers<[1], [0], [0], [1], [0, 0, 1, 1], [], []>} : vector<16x128xbf16>, vector<128x384xbf16>, vector<16x384xf32> -> vector<16x384xf32>
    %289 = vector.extract_strided_slice %285 {offsets = [0, 0], sizes = [16, 128], strides = [1, 1]} : vector<16x384xf32> to vector<16x128xf32>
    %290 = vector.extract_strided_slice %288 {offsets = [0, 0], sizes = [16, 128], strides = [1, 1]} : vector<16x384xf32> to vector<16x128xf32>
    %291 = arith.addf %289, %290 : vector<16x128xf32>
    %292 = arith.negf %291 : vector<16x128xf32>
    %293 = math.exp %292 : vector<16x128xf32>
    %cst_82 = arith.constant 1.000000e+00 : f32
    %294 = vector.broadcast %cst_82 : f32 to vector<16x128xf32>
    %295 = arith.addf %294, %293 : vector<16x128xf32>
    %296 = arith.divf %294, %295 : vector<16x128xf32>
    %297 = vector.extract_strided_slice %285 {offsets = [0, 128], sizes = [16, 128], strides = [1, 1]} : vector<16x384xf32> to vector<16x128xf32>
    %298 = vector.extract_strided_slice %288 {offsets = [0, 128], sizes = [16, 128], strides = [1, 1]} : vector<16x384xf32> to vector<16x128xf32>
    %299 = arith.addf %297, %298 : vector<16x128xf32>
    %300 = arith.negf %299 : vector<16x128xf32>
    %301 = math.exp %300 : vector<16x128xf32>
    %cst_83 = arith.constant 1.000000e+00 : f32
    %302 = vector.broadcast %cst_83 : f32 to vector<16x128xf32>
    %303 = arith.addf %302, %301 : vector<16x128xf32>
    %304 = arith.divf %302, %303 : vector<16x128xf32>
    %305 = vector.extract_strided_slice %285 {offsets = [0, 256], sizes = [16, 128], strides = [1, 1]} : vector<16x384xf32> to vector<16x128xf32>
    %306 = vector.extract_strided_slice %288 {offsets = [0, 256], sizes = [16, 128], strides = [1, 1]} : vector<16x384xf32> to vector<16x128xf32>
    %c0_84 = arith.constant 0 : index
    %c0_85 = arith.constant 0 : index
    %307 = vector.load %arg7[%c0_84, %c0_85] : memref<1x128xf32, #tpu.memory_space<vmem>>, vector<1x128xf32>
    %308 = vector.broadcast %307 : vector<1x128xf32> to vector<16x128xf32>
    %309 = arith.addf %306, %308 : vector<16x128xf32>
    %310 = arith.mulf %296, %309 : vector<16x128xf32>
    %311 = arith.addf %305, %310 : vector<16x128xf32>
    %312 = math.tanh %311 : vector<16x128xf32>
    %cst_86 = arith.constant 1.000000e+00 : f32
    %313 = vector.broadcast %cst_86 : f32 to vector<16x128xf32>
    %314 = arith.subf %313, %304 : vector<16x128xf32>
    %315 = arith.mulf %314, %312 : vector<16x128xf32>
    %316 = arith.mulf %304, %282 : vector<16x128xf32>
    %317 = arith.addf %315, %316 : vector<16x128xf32>
    %c7_i32 = arith.constant 7 : i32
    %318 = vector.broadcast %c7_i32 : i32 to vector<16x1xi32>
    %319 = arith.cmpi sgt, %1, %318 : vector<16x1xi32>
    %320 = vector.shape_cast %319 : vector<16x1xi1> to vector<16x1xi1>
    %321 = vector.broadcast %320 : vector<16x1xi1> to vector<16x128xi1>
    %322 = arith.select %321, %317, %282 : vector<16x128xi1>, vector<16x128xf32>
    %c0_87 = arith.constant 0 : index
    %c0_88 = arith.constant 0 : index
    %323 = vector.load %arg9[%c0_87, %c0_88] : memref<16x128xf32, #tpu.memory_space<vmem>>, vector<16x128xf32>
    tpu.vector_store %arg9[%c0_87, %c0_88], %322 {strides = array<i32>} : memref<16x128xf32, #tpu.memory_space<vmem>>, vector<16x128xf32>,
    return
  }
  func.func @transform_0(%arg0: i32, %arg1: memref<1xi32, #tpu.memory_space<smem>>) -> (i32, i32) {
    %c0_i32 = arith.constant 0 : i32
    %c0_i32_0 = arith.constant 0 : i32
    return %arg0, %c0_i32 : i32, i32
  }
  func.func @transform_1(%arg0: i32, %arg1: memref<1xi32, #tpu.memory_space<smem>>) -> (i32, i32, i32) {
    %c0_i32 = arith.constant 0 : i32
    %c0_i32_0 = arith.constant 0 : i32
    %c0_i32_1 = arith.constant 0 : i32
    return %c0_i32, %arg0, %c0_i32_0 : i32, i32, i32
  }
  func.func @transform_2(%arg0: i32, %arg1: memref<1xi32, #tpu.memory_space<smem>>) -> (i32, i32) {
    %c0_i32 = arith.constant 0 : i32
    %c0_i32_0 = arith.constant 0 : i32
    %c0_i32_1 = arith.constant 0 : i32
    return %c0_i32, %c0_i32_0 : i32, i32
  }
  func.func @transform_3(%arg0: i32, %arg1: memref<1xi32, #tpu.memory_space<smem>>) -> (i32, i32) {
    %c0_i32 = arith.constant 0 : i32
    %c0_i32_0 = arith.constant 0 : i32
    %c0_i32_1 = arith.constant 0 : i32
    return %c0_i32, %c0_i32_0 : i32, i32
  }
  func.func @transform_4(%arg0: i32, %arg1: memref<1xi32, #tpu.memory_space<smem>>) -> (i32, i32) {
    %c0_i32 = arith.constant 0 : i32
    %c0_i32_0 = arith.constant 0 : i32
    %c0_i32_1 = arith.constant 0 : i32
    return %c0_i32, %c0_i32_0 : i32, i32
  }
  func.func @transform_5(%arg0: i32, %arg1: memref<1xi32, #tpu.memory_space<smem>>) -> (i32, i32) {
    %c0_i32 = arith.constant 0 : i32
    %c0_i32_0 = arith.constant 0 : i32
    %c0_i32_1 = arith.constant 0 : i32
    return %c0_i32, %c0_i32_0 : i32, i32
  }
  func.func @transform_6(%arg0: i32, %arg1: memref<1xi32, #tpu.memory_space<smem>>) -> (i32, i32) {
    %c0_i32 = arith.constant 0 : i32
    %c0_i32_0 = arith.constant 0 : i32
    return %arg0, %c0_i32 : i32, i32
  }
  func.func @transform_7(%arg0: i32, %arg1: memref<1xi32, #tpu.memory_space<smem>>) -> (i32, i32) {
    %c0_i32 = arith.constant 0 : i32
    %c0_i32_0 = arith.constant 0 : i32
    return %arg0, %c0_i32 : i32, i32
  }
}

</mosaic_0001>

<bundles_post_ra>
// kernel: tpu_custom_call.1
= control target key start
LH: loop header
LB: loop body
LE: loop exit
PB: predicated region body
PF: predicated region fallthrough
CT: control target
= control target key end

     0   :  { %14 = vsyncpa [#allocation6], 0  ;;  %s3203_s0 = inlined_call_operand.<no memory space> [shape: s32[1], index: 0, kind: input, shape index: {}]   ;;  %s3204_s1 = inlined_call_operand.vmem [shape: s32[16,1], index: 1, kind: input, shape index: {}]   ;;  %s3205_s2 = inlined_call_operand.hbm [shape: bf16[8,16,16], index: 2, kind: input, shape index: {}]   ;;  %s3206_s3 = inlined_call_operand.hbm [shape: bf16[16,384], index: 3, kind: input, shape index: {}]   ;;  %s3207_s4 = inlined_call_operand.hbm [shape: bf16[128,384], index: 4, kind: input, shape index: {}]   ;;  %s3208_s5 = inlined_call_operand.vmem [shape: f32[1,384], index: 5, kind: input, shape index: {}]   ;;  %s3209_s6 = inlined_call_operand.vmem [shape: f32[1,128], index: 6, kind: input, shape index: {}]   ;;  %s3210_s7 = inlined_call_operand.vmem [shape: f32[16,128], index: 7, kind: input, shape index: {}]   ;;  %s3211_s8 = inlined_call_operand.hbm [shape: f32[16,128], index: 8, kind: output, shape index: {}]  }
   0x1   :  { %15 = vsyncpa [#allocation9], 0 }
   0x2   :  { %16 = vsyncpa [#allocation7], 0  ;;  %s2531_s26 = smov [#allocation8]  }
   0x3   :  { %s36_s27 = sshll.u32 %s2531_s26, 4  ;;  %s37_s27 = int_to_ptr.vmem [resolvable:$true] %s36_s27 }
   0x4   :  { %s2445_s28 = scalar_lea.vmem %s37_s27, 384  ;;  %p2450_p1 = scmp.lt.s32.totalorder %s37_s27, %s37_s27 }
   0x5   :  { %p2446_p0 = scmp.ne.s32.totalorder %s37_s27, %s2445_s28  ;;  %p2451_p2 = scmp.lt.s32.totalorder %s2445_s28, %s2445_s28 }
   0x7   :  { %p2452_p3 = por %p2451_p2, %p2450_p1 }
   0x9   :  { %p2453_p4 = pnand %p2452_p3, %p2446_p0 }
   0xb   :  { %2456 = shalt.err (!%p2453_p4)
}
   0xc   :  { %s2532_s29 = smov 192   ;;  %s2533_s30 = smov 12  }
   0xd   :  { %42 = dma.hbm_to_vmem [thread:$0]  %s3206_s3, 384, %s37_s27, [#allocation9], %s2532_s29, %s2532_s29, %s2533_s30  }
   0xe   :  { %s2534_s11 = smov [#allocation5]  }
   0xf   :  { %s24_s12 = sshll.u32 %s2534_s11, 4  ;;  %s25_s12 = int_to_ptr.vmem [resolvable:$true] %s24_s12 }
  0x10   :  { %s2465_s13 = scalar_lea.vmem %s25_s12, 1024  ;;  %p2470_p6 = scmp.lt.s32.totalorder %s25_s12, %s25_s12 }
  0x11   :  { %p2466_p5 = scmp.ne.s32.totalorder %s25_s12, %s2465_s13  ;;  %p2471_p7 = scmp.lt.s32.totalorder %s2465_s13, %s2465_s13 }
  0x13   :  { %p2472_p8 = por %p2471_p7, %p2470_p6 }
  0x15   :  { %p2473_p9 = pnand %p2472_p8, %p2466_p5 }
  0x17   :  { %2476 = shalt.err (!%p2473_p9)
}
  0x18   :  { %s2535_s14 = smov 64   ;;  %s2536_s15 = smov 4  }
  0x19   :  { %30 = dma.hbm_to_vmem [thread:$0]  %s3205_s2, 1024, %s25_s12, [#allocation6], %s2535_s14, %s2535_s14, %s2536_s15  }
  0x1a   :  { %s2537_s18 = smov [#allocation10]  }
  0x1b   :  { %s48_s19 = sshll.u32 %s2537_s18, 4  ;;  %s49_s19 = int_to_ptr.vmem [resolvable:$true] %s48_s19 }
  0x1c   :  { %s2485_s3 = scalar_lea.vmem %s49_s19, 3072  ;;  %p2490_p11 = scmp.lt.s32.totalorder %s49_s19, %s49_s19 }
  0x1d   :  { %p2486_p10 = scmp.ne.s32.totalorder %s49_s19, %s2485_s3  ;;  %p2491_p12 = scmp.lt.s32.totalorder %s2485_s3, %s2485_s3 }
  0x1f   :  { %p2492_p13 = por %p2491_p12, %p2490_p11 }
  0x21   :  { %p2493_p0 = pnand %p2492_p13, %p2486_p10 }
  0x23   :  { %2496 = shalt.err (!%p2493_p0)
}
  0x24   :  { %54 = dma.hbm_to_vmem [thread:$0]  %s3207_s4, 3072, %s49_s19, [#allocation9], %s2532_s29, %s2532_s29, %s2533_s30  }
  0x25   :  { %2521 = dma.done.wait [#allocation6], 1024  }
  0x26   :  { %2522 = vsyncadd [#allocation6], 4294966272 }
  0x27   :  { %2523 = dma.done.wait [#allocation9], 3456  }
  0x28   :  { %2524 = vsyncadd [#allocation9], 4294963840  ;;  %s2599_s22 = smov 0  }
  0x29 LB: > { %v2210_v0 = vld [vmem:[#allocation8 + $0x4] ss:$12 sps:$4 sm:$0xff]   ;;  %v2212_v1 = vld [vmem:[#allocation8] ss:$12 sps:$4 sm:$0xff]   ;;  %v2538_v2 = vmov 0   ;;  %s1921_s2 = sshll.u32 %s2529_s22, 5  ;;  %v95_v8 = vlaneseq  ;;  %s2529_s22 = sphi %s2599_s22, %s76_s22  }
  0x2a   : > { %191 = vmatprep.mubr.bf16.mxu0 %v2538_v2  ;;  %221 = vmatprep.mubr.bf16.mxu1 %v2538_v2  ;;  %v2215_v3 = vld [vmem:[#allocation8 + $0x8] ss:$12 sps:$4 sm:$0xff]   ;;  %vm146_vm0 = vcmask 130048   ;;  %s80_s4 = scalar_lea.vmem [#allocation5], %s1921_s2  ;;  %v93_v12 = vld [vmem:[%s3208_s5] sm:$0x7] }
  0x2b   : > { %173 = vmatprep.subr.bf16.mxu0 %v2210_v0  ;;  %2186 = vmatprep.subr.bf16.mxu1 %v2210_v0  ;;  %v2213_v4 = vld [vmem:[%s80_s4] sm:$0xff]   ;;  %v2214_v5 = vld [vmem:[%s80_s4 + $0x18] sm:$0xff]   ;;  %v2216_v6 = vld [vmem:[%s80_s4 + $0x8] sm:$0xff]   ;;  %v96_v9 = vshrl.u32 %v95_v8, 7  ;;  %s1938_s24 = smul.u32 96, %s2529_s22  ;;  %s76_s22 = sadd.s32 1, %s2529_s22  }
  0x2c   : > { %174 = vmatpush1.bf16.msra.mxu0 %v2212_v1  ;;  %2187 = vmatpush1.bf16.msra.mxu1 %v2212_v1  ;;  %v2217_v7 = vld [vmem:[%s80_s4 + $0x10] sm:$0xff]   ;;  %p73_p1 = scmp.ge.s32.totalorder %s76_s22, 2  }
  0x2d   : > { %2016 = vmatprep.subr.bf16.mxu1 %v2215_v3  ;;  %v97_v10 = vsub.s32 0, %v96_v9  ;;  %v101_v11 = vsub.s32 1, %v96_v9  ;;  %v105_v18 = vsub.s32 2, %v96_v9  ;;  %s2627_s25 = scalar_lea.vmem [#allocation2], %s1938_s24  ;;  %vm2541_vm1 = vmmov (%p73_p1), 0  }
  0x2f   : > { %1837 = vmatmul.mubr.msk.bf16.vlgmr.msra.gmra.mxu0 %vm146_vm0, %v2213_v4  ;;  %1840 = vmatmul.mubr.msk.bf16.vlgmr.msra.gmra.mxu1 %vm146_vm0, %v2214_v5  ;;  %v2616_v13 = vrot.slane %v93_v12, %v97_v10  ;;  %v2618_v14 = vrot.slane %v93_v12, %v101_v11  ;;  %v2625_v29 = vrot.slane %v93_v12, %v105_v18 }
  0x30   : > { %201 = vmatprep.mubr.bf16.mxu0 %v2538_v2  ;;  %2017 = vmatpush3.bf16.msra.mxu1 %v2215_v3 }
  0x31   : > { %2018 = vmatprep.mubr.msk.bf16.mxu1 %vm146_vm0, %v2213_v4 }
  0x37   : > { %1838 = vmatmul.mubr.msk.bf16.gmra.mxu0 %vm146_vm0, %v2216_v6  ;;  %2019 = vmatmul.mubr.msk.bf16.vlgmr.msra.gmra.mxu1 %vm146_vm0, %v2216_v6 }
  0x38   : > { %211 = vmatprep.mubr.bf16.mxu0 %v2538_v2  ;;  %2022 = vmatprep.mubr.msk.bf16.mxu1 %vm146_vm0, %v2217_v7 }
  0x3f   : > { %1839 = vmatmul.mubr.msk.bf16.gmra.mxu0 %vm146_vm0, %v2217_v7  ;;  %2023 = vmatmul.mubr.msk.bf16.gmra.mxu1 %vm146_vm0, %v2214_v5 }
  0xef   : > { %v193_v15 = vpop.f32.mrf.mxu0  ;;  %v223_v16 = vpop.f32.mrf.mxu1 }
  0xf0   : > { %v194_v19 = vadd.f32 %v193_v15, %v2616_v13  ;;  %v224_v22 = vadd.f32 %v223_v16, %v2616_v13 }
  0xf1   : > { %v195_v17 = vpop.f32.mrf.mxu0  ;;  %v225_v21 = vpop.f32.mrf.mxu1 }
  0xf2   : > { %v196_v20 = vadd.f32 %v195_v17, %v2618_v14  ;;  %v226_v23 = vadd.f32 %v225_v21, %v2618_v14  ;;  %v2675_v21 = vld [vmem:[#allocation10 + $0x94] ss:$12 sps:$4 sm:$0xff] (%p73_p1)  }
  0xf3   : > { %v197_v24 = vpop.f32.mrf.mxu0  ;;  %v227_v26 = vpop.f32.mrf.mxu1 }
  0xf4   : > { %v1922_v25 = vpack.c.bf16 %v196_v20, %v194_v19  ;;  %v1934_v27 = vpack.c.bf16 %v226_v23, %v224_v22  ;;  %v198_v30 = vadd.f32 %v197_v24, %v2616_v13  ;;  %v228_v33 = vadd.f32 %v227_v26, %v2616_v13  ;;  %v2668_v19 = vld [vmem:[#allocation10 + $0xac] ss:$12 sps:$4 sm:$0xff] (%p73_p1)   ;;  %v2680_v22 = vld [vmem:[#allocation10 + $0x90] ss:$12 sps:$4 sm:$0xff] (%p73_p1)  }
  0xf5   : > { %v199_v28 = vpop.f32.mrf.mxu0  ;;  %v229_v32 = vpop.f32.mrf.mxu1  ;;  %v2540_v20 = vmov (%p73_p1), 0   ;;  %571 = vmatprep.subr.bf16.mxu0 (%p73_p1), %v2668_v19  ;;  %v2684_v23 = vld [vmem:[#allocation10 + $0x7c] ss:$12 sps:$4 sm:$0xff] (%p73_p1)   ;;  %v2688_v24 = vld [vmem:[#allocation10 + $0x78] ss:$12 sps:$4 sm:$0xff] (%p73_p1)  }
  0xf6   : > { %380 = vst [vmem:[%s2627_s25] sm:$0xff] %v1922_v25  ;;  %v200_v31 = vadd.f32 %v199_v28, %v2618_v14  ;;  %392 = vst [vmem:[%s2627_s25 + $0x48] sm:$0xff] %v1934_v27  ;;  %v230_v34 = vadd.f32 %v229_v32, %v2618_v14  ;;  %603 = vmatprep.mubr.bf16.mxu0 (%p73_p1), %v2540_v20  ;;  %2218 = vset.pattern.permute.xlu0 (%p73_p1), %v2540_v20  ;;  %v2691_v25 = vld [vmem:[#allocation10 + $0x64] ss:$12 sps:$4 sm:$0xff] (%p73_p1)   ;;  %v2696_v27 = vld [vmem:[#allocation10 + $0x60] ss:$12 sps:$4 sm:$0xff] (%p73_p1)  }
  0xf7   : > { %v203_v35 = vpop.f32.mrf.mxu0  ;;  %v2020_v37 = vpop.f32.mrf.mxu1  ;;  %2219 = vset.pattern.permute.xlu1 (%p73_p1), %v2540_v20  ;;  %v2693_v26 = vld [vmem:[#allocation10 + $0xb0] ss:$12 sps:$4 sm:$0xff] (%p73_p1)   ;;  %v2699_v28 = vld [vmem:[#allocation10 + $0x4c] ss:$12 sps:$4 sm:$0xff] (%p73_p1)  }
  0xf8   : > { %v1924_v36 = vpack.c.bf16 %v200_v31, %v198_v30  ;;  %v1936_v38 = vpack.c.bf16 %v230_v34, %v228_v33  ;;  %v275_v39 = vadd.f32 %v2020_v37, %v2625_v29  ;;  %v204_v41 = vadd.f32 %v203_v35, %v2616_v13  ;;  %v2705_v30 = vld [vmem:[#allocation10 + $0x48] ss:$12 sps:$4 sm:$0xff] (%p73_p1)   ;;  %v2712_v32 = vld [vmem:[#allocation10 + $0x80] ss:$12 sps:$4 sm:$0xff] (%p73_p1)   ;;  %v2716_v33 = vld [vmem:[#allocation10 + $0x30] ss:$12 sps:$4 sm:$0xff] (%p73_p1)  }
  0xf9   : > { %v205_v40 = vpop.f32.mrf.mxu0  ;;  %v266_v43 = vpop.f32.mrf.mxu1  ;;  %v2708_v31 = vld [vmem:[#allocation10 + $0x34] ss:$12 sps:$4 sm:$0xff] (%p73_p1)   ;;  %v2721_v34 = vld [vmem:[%s3204_s1] sm:$0xff] (%p73_p1) }
  0xfa   : > { %382 = vst [vmem:[%s2627_s25 + $0xc] sm:$0xff] %v1924_v36  ;;  %v206_v42 = vadd.f32 %v205_v40, %v2618_v14  ;;  %394 = vst [vmem:[%s2627_s25 + $0x54] sm:$0xff] %v1936_v38  ;;  %v1927_v44 = vpack.c.bf16 %v275_v39, %v275_v39  ;;  %v267_v45 = vadd.f32 %v266_v43, %v2625_v29  ;;  %v2726_v35 = vld [vmem:[%s3204_s1 + $0x8] sm:$0xff] (%p73_p1)  ;;  %v2729_v36 = vld [vmem:[#allocation10 + $0x1c] ss:$12 sps:$4 sm:$0xff] (%p73_p1)   ;;  %vm706_vm2 = vcmp.gt.s32.totalorder (%p73_p1), %v2721_v34, 0 }
  0xfb   : > { %v207_v46 = vpop.f32.mrf.mxu0  ;;  %v2021_v48 = vpop.f32.mrf.mxu1  ;;  %v2732_v37 = vld [vmem:[#allocation10 + $0x68] ss:$12 sps:$4 sm:$0xff] (%p73_p1)   ;;  %vm707_vm3 = vcmp.gt.s32.totalorder (%p73_p1), %v2726_v35, 0  ;;  %v708_v38 = vsel (%p73_p1), %vm706_vm2, 1, %v2540_v20  ;;  %v2739_v39 = vld [vmem:[#allocation10 + $0x18] ss:$12 sps:$4 sm:$0xff] (%p73_p1)  }
  0xfc   : > { %v1926_v47 = vpack.c.bf16 %v206_v42, %v204_v41  ;;  %385 = vst [vmem:[%s2627_s25 + $0x20] sm:$0xf] %v1927_v44  ;;  %v1923_v49 = vpack.c.bf16 %v267_v45, %v267_v45  ;;  %v278_v50 = vadd.f32 %v2021_v48, %v2625_v29  ;;  %v208_v52 = vadd.f32 %v207_v46, %v2616_v13  ;;  %v2743_v41 = vld [vmem:[#allocation10 + $0x4] ss:$12 sps:$4 sm:$0xff] (%p73_p1)   ;;  %v2751_v43 = vld [vmem:[#allocation10] ss:$12 sps:$4 sm:$0xff] (%p73_p1)  }
  0xfd   : > { %v209_v51 = vpop.f32.mrf.mxu0  ;;  %v269_v54 = vpop.f32.mrf.mxu1  ;;  %711 = vperm.xlu0 (%p73_p1), %2218, %v708_v38   ;;  %v709_v40 = vsel (%p73_p1), %vm707_vm3, 1, %v2540_v20  ;;  %v2746_v42 = vld [vmem:[#allocation10 + $0x50] ss:$12 sps:$4 sm:$0xff] (%p73_p1)   ;;  %vm1014_vm4 = vcmp.gt.s32.totalorder (%p73_p1), %v2721_v34, 2  ;;  %v2756_v44 = vld [vmem:[%s3210_s7] sm:$0xff] (%p73_p1)  ;;  %vm1168_vm5 = vcmp.gt.s32.totalorder (%p73_p1), %v2721_v34, 3 }
  0xfe   : > { %384 = vst [vmem:[%s2627_s25 + $0x18] sm:$0xff] %v1926_v47  ;;  %v210_v53 = vadd.f32 %v209_v51, %v2618_v14  ;;  %381 = vst [vmem:[%s2627_s25 + $0x8] sm:$0xf] %v1923_v49  ;;  %v1929_v55 = vpack.c.bf16 %v278_v50, %v278_v50  ;;  %v270_v56 = vadd.f32 %v269_v54, %v2625_v29  ;;  %v2761_v45 = vld [vmem:[%s3210_s7 + $0x8] sm:$0xff] (%p73_p1)  ;;  %v1016_v46 = vsel (%p73_p1), %vm1014_vm4, 1, %v2540_v20 }
  0xff   : > { %v213_v57 = vpop.f32.mrf.mxu0  ;;  %v2024_v59 = vpop.f32.mrf.mxu1  ;;  %v2766_v47 = vld [vmem:[#allocation10 + $0x38] ss:$12 sps:$4 sm:$0xff] (%p73_p1)   ;;  %v410_v48 = vpack.c.bf16 (%p73_p1), %v2761_v45, %v2756_v44  ;;  %v1170_v49 = vsel (%p73_p1), %vm1168_vm5, 1, %v2540_v20  ;;  %v2775_v50 = vld [vmem:[#allocation10 + $0x20] ss:$12 sps:$4 sm:$0xff] (%p73_p1)   ;;  %vm1322_vm6 = vcmp.gt.s32.totalorder (%p73_p1), %v2721_v34, 4 }
 0x100   : > { %v1928_v58 = vpack.c.bf16 %v210_v53, %v208_v52  ;;  %387 = vst [vmem:[%s2627_s25 + $0x2c] sm:$0xf] %v1929_v55  ;;  %v1925_v60 = vpack.c.bf16 %v270_v56, %v270_v56  ;;  %v291_v61 = vadd.f32 %v2024_v59, %v2625_v29  ;;  %v214_v63 = vadd.f32 %v213_v57, %v2616_v13  ;;  %v2784_v52 = vld [vmem:[#allocation10 + $0x8] ss:$12 sps:$4 sm:$0xff] (%p73_p1)  }
 0x101   : > { %v215_v62 = vpop.f32.mrf.mxu0  ;;  %v282_v1 = vpop.f32.mrf.mxu1  ;;  %714 = vperm.xlu0 (%p73_p1), %2218, %v709_v40   ;;  %v1324_v51 = vsel (%p73_p1), %vm1322_vm6, 1, %v2540_v20  ;;  %vm1476_vm7 = vcmp.gt.s32.totalorder (%p73_p1), %v2721_v34, 5  ;;  %vm1630_vm8 = vcmp.gt.s32.totalorder (%p73_p1), %v2721_v34, 6  ;;  %vm1784_vm9 = vcmp.gt.s32.totalorder (%p73_p1), %v2721_v34, 7 }
 0x102   : > { %386 = vst [vmem:[%s2627_s25 + $0x24] sm:$0xff] %v1928_v58  ;;  %v216_v0 = vadd.f32 %v215_v62, %v2618_v14  ;;  %383 = vst [vmem:[%s2627_s25 + $0x14] sm:$0xf] %v1925_v60  ;;  %v1935_v2 = vpack.c.bf16 %v291_v61, %v291_v61  ;;  %v283_v3 = vadd.f32 %v282_v1, %v2625_v29  ;;  %v1478_v53 = vsel (%p73_p1), %vm1476_vm7, 1, %v2540_v20 }
 0x103   : > { %v217_v4 = vpop.f32.mrf.mxu0  ;;  %v2025_v6 = vpop.f32.mrf.mxu1  ;;  %v1632_v54 = vsel (%p73_p1), %vm1630_vm8, 1, %v2540_v20  ;;  %v1786_v55 = vsel (%p73_p1), %vm1784_vm9, 1, %v2540_v20  ;;  %vm860_vm10 = vcmp.gt.s32.totalorder (%p73_p1), %v2721_v34, 1  ;;  %vm861_vm11 = vcmp.gt.s32.totalorder (%p73_p1), %v2726_v35, 1 }
 0x104   : > { %v1930_v5 = vpack.c.bf16 %v216_v0, %v214_v63  ;;  %393 = vst [vmem:[%s2627_s25 + $0x50] sm:$0xf] %v1935_v2  ;;  %v1931_v7 = vpack.c.bf16 %v283_v3, %v283_v3  ;;  %v294_v8 = vadd.f32 %v2025_v6, %v2625_v29  ;;  %v218_v10 = vadd.f32 %v217_v4, %v2616_v13  ;;  %v2670_v13 = vld [vmem:[#allocation10 + $0xa8] ss:$12 sps:$4 sm:$0xff] (%p73_p1)  }
 0x105   : > { %v219_v9 = vpop.f32.mrf.mxu0  ;;  %v285_v12 = vpop.f32.mrf.mxu1  ;;  %572 = vmatpush1.bf16.msra.mxu0 (%p73_p1), %v2670_v13  ;;  %1019 = vperm.xlu0 (%p73_p1), %2218, %v1016_v46   ;;  %v862_v56 = vsel (%p73_p1), %vm860_vm10, 1, %v2540_v20  ;;  %v863_v57 = vsel (%p73_p1), %vm861_vm11, 1, %v2540_v20  ;;  %vm1015_vm12 = vcmp.gt.s32.totalorder (%p73_p1), %v2726_v35, 2  ;;  %vm1169_vm13 = vcmp.gt.s32.totalorder (%p73_p1), %v2726_v35, 3 }
 0x106   : > { %388 = vst [vmem:[%s2627_s25 + $0x30] sm:$0xff] %v1930_v5  ;;  %v220_v11 = vadd.f32 %v219_v9, %v2618_v14  ;;  %389 = vst [vmem:[%s2627_s25 + $0x38] sm:$0xf] %v1931_v7  ;;  %v1937_v15 = vpack.c.bf16 %v294_v8, %v294_v8  ;;  %v286_v16 = vadd.f32 %v285_v12, %v2625_v29  ;;  %75 = sbr.rel (!%p73_p1) target bundleno = 41 (0x29), region = 76  ;;  %v2539_v14 = vmov (%p73_p1), 0.0   ;;  %573 = vmatprep.subr.bf16.mxu0 (%p73_p1), %v2675_v21 }
 0x107   :  { %2026 = vmatprep.subr.bf16.mxu1 (%p73_p1), %v2539_v14  ;;  %2042 = vmatprep.mubr.msk.bf16.mxu1 (%p73_p1), %vm2541_vm1, %v2539_v14  ;;  %v2702_v29 = vld [vmem:[#allocation10 + $0x98] ss:$12 sps:$4 sm:$0xff] (%p73_p1)   ;;  %v1017_v58 = vsel (%p73_p1), %vm1015_vm12, 1, %v2540_v20  ;;  %v1171_v59 = vsel (%p73_p1), %vm1169_vm13, 1, %v2540_v20  ;;  %vm1323_vm14 = vcmp.gt.s32.totalorder (%p73_p1), %v2726_v35, 4  ;;  %vm1477_vm15 = vcmp.gt.s32.totalorder (%p73_p1), %v2726_v35, 5 }
 0x108   : > { %v1932_v17 = vpack.c.bf16 %v220_v11, %v218_v10  ;;  %395 = vst [vmem:[%s2627_s25 + $0x5c] sm:$0xf] %v1937_v15  ;;  %v1933_v18 = vpack.c.bf16 %v286_v16, %v286_v16  ;;  %2027 = vmatpush3.bf16.msra.mxu1 (%p73_p1), %v2693_v26  ;;  %865 = vperm.xlu1 (%p73_p1), %2219, %v862_v56   ;;  %v1325_v60 = vsel (%p73_p1), %vm1323_vm14, 1, %v2540_v20  ;;  %v1479_v61 = vsel (%p73_p1), %vm1477_vm15, 1, %v2540_v20 }
 0x109   :  { %574 = vmatpush1.bf16.msra.mxu0 (%p73_p1), %v2680_v22  ;;  %2028 = vmatprep.subr.bf16.mxu1 (%p73_p1), %v2539_v14  ;;  %vm1631_vm0 = vcmp.gt.s32.totalorder (%p73_p1), %v2726_v35, 6  ;;  %vm1785_vm2 = vcmp.gt.s32.totalorder (%p73_p1), %v2726_v35, 7 }
 0x10a   : > { %390 = vst [vmem:[%s2627_s25 + $0x3c] sm:$0xff] %v1932_v17  ;;  %391 = vst [vmem:[%s2627_s25 + $0x44] sm:$0xf] %v1933_v18  ;;  %575 = vmatprep.subr.bf16.mxu0 (%p73_p1), %v2684_v23  ;;  %1173 = vperm.xlu0 (%p73_p1), %2218, %v1170_v49   ;;  %v1633_v62 = vsel (%p73_p1), %vm1631_vm0, 1, %v2540_v20  ;;  %v1787_v63 = vsel (%p73_p1), %vm1785_vm2, 1, %v2540_v20 }
 0x10c   :  { %2029 = vmatpush3.bf16.msra.mxu1 %v2702_v29  ;;  %868 = vperm.xlu1 %2219, %v863_v57  }
 0x10d   :  { %576 = vmatpush1.bf16.msra.mxu0 %v2688_v24  ;;  %2030 = vmatprep.subr.bf16.mxu1 %v2539_v14 }
 0x10e   :  { %577 = vmatprep.subr.bf16.mxu0 %v2691_v25  ;;  %1327 = vperm.xlu0 %2218, %v1324_v51  }
 0x110   :  { %2031 = vmatpush3.bf16.msra.mxu1 %v2712_v32  ;;  %1022 = vperm.xlu1 %2219, %v1017_v58  }
 0x111   :  { %578 = vmatpush1.bf16.msra.mxu0 %v2696_v27  ;;  %2032 = vmatprep.subr.bf16.mxu1 %v2539_v14  ;;  %v400_v0 = vld [vmem:[#allocation2] sm:$0xff]  ;;  %v402_v2 = vld [vmem:[#allocation2 + $0xc] sm:$0xff]  ;;  %v401_v56 = vld [vmem:[#allocation2 + $0x8] ss:$12 sps:$4 sm:$0xff]  }
 0x112   :  { %579 = vmatprep.subr.bf16.mxu0 %v2699_v28  ;;  %1481 = vperm.xlu0 %2218, %v1478_v53   ;;  %v404_v1 = vunpack.c.l.bf16 %v400_v0  ;;  %v407_v5 = vunpack.c.l.bf16 %v402_v2  ;;  %v405_v8 = vunpack.c.h.bf16 %v400_v0  ;;  %v408_v11 = vunpack.c.h.bf16 %v402_v2 }
 0x114   :  { %2033 = vmatpush3.bf16.msra.mxu1 %v2732_v37  ;;  %1176 = vperm.xlu1 %2219, %v1171_v59  }
 0x115   :  { %580 = vmatpush1.bf16.msra.mxu0 %v2705_v30  ;;  %2034 = vmatprep.subr.bf16.mxu1 %v2539_v14 }
 0x116   :  { %581 = vmatprep.subr.bf16.mxu0 %v2708_v31  ;;  %1635 = vperm.xlu0 %2218, %v1632_v54  }
 0x118   :  { %2035 = vmatpush3.bf16.msra.mxu1 %v2746_v42  ;;  %1330 = vperm.xlu1 %2219, %v1325_v60   ;;  %v406_v60 = vunpack.c.l.bf16 %v401_v56 }
 0x119   :  { %582 = vmatpush1.bf16.msra.mxu0 %v2716_v33  ;;  %2036 = vmatprep.subr.bf16.mxu1 %v2539_v14 }
 0x11a   :  { %583 = vmatprep.subr.bf16.mxu0 %v2729_v36  ;;  %1789 = vperm.xlu0 %2218, %v1786_v55   ;;  %v2847_v55 = vld [vmem:[%s3209_s6] ss:$0 sm:$0xff] }
 0x11c   :  { %2037 = vmatpush3.bf16.msra.mxu1 %v2766_v47  ;;  %1484 = vperm.xlu1 %2219, %v1479_v61  }
 0x11d   :  { %584 = vmatpush1.bf16.msra.mxu0 %v2739_v39  ;;  %2038 = vmatprep.subr.bf16.mxu1 %v2539_v14 }
 0x11e   :  { %585 = vmatprep.subr.bf16.mxu0 %v2743_v41 }
 0x120   :  { %2039 = vmatpush3.bf16.msra.mxu1 %v2775_v50  ;;  %1638 = vperm.xlu1 %2219, %v1633_v62  }
 0x121   :  { %586 = vmatpush1.bf16.msra.mxu0 %v2751_v43  ;;  %2040 = vmatprep.subr.bf16.mxu1 %v2539_v14 }
 0x122   :  { %732 = vmatprep.subr.bf16.mxu0 %v2668_v19 }
 0x124   :  { %604 = vmatmul.mubr.bf16.vlgmr.msra.gmra.mxu0 %v410_v48  ;;  %2041 = vmatpush3.bf16.msra.mxu1 %v2784_v52 }
 0x125   :  { %733 = vmatpush1.bf16.msra.mxu0 %v2670_v13  ;;  %764 = vmatprep.mubr.bf16.mxu0 %v2540_v20 }
 0x126   :  { %734 = vmatprep.subr.bf16.mxu0 %v2675_v21  ;;  %2046 = vmatprep.subr.bf16.mxu1 %v2539_v14 }
 0x127   :  { %2043 = vmatmul.mubr.bf16.vlgmr.msra.gmra.mxu1 %v410_v48  ;;  %1792 = vperm.xlu1 %2219, %v1787_v63  }
 0x128   :  { %2047 = vmatpush3.bf16.msra.mxu1 %v2693_v26  ;;  %2062 = vmatprep.mubr.msk.bf16.mxu1 %vm2541_vm1, %v2539_v14 }
 0x129   :  { %735 = vmatpush1.bf16.msra.mxu0 %v2680_v22  ;;  %2048 = vmatprep.subr.bf16.mxu1 %v2539_v14 }
 0x12a   :  { %736 = vmatprep.subr.bf16.mxu0 %v2684_v23 }
 0x12c   :  { %2049 = vmatpush3.bf16.msra.mxu1 %v2702_v29 }
 0x12d   :  { %737 = vmatpush1.bf16.msra.mxu0 %v2688_v24  ;;  %2050 = vmatprep.subr.bf16.mxu1 %v2539_v14 }
 0x12e   :  { %738 = vmatprep.subr.bf16.mxu0 %v2691_v25 }
 0x130   :  { %2051 = vmatpush3.bf16.msra.mxu1 %v2712_v32 }
 0x131   :  { %739 = vmatpush1.bf16.msra.mxu0 %v2696_v27  ;;  %2052 = vmatprep.subr.bf16.mxu1 %v2539_v14 }
 0x132   :  { %740 = vmatprep.subr.bf16.mxu0 %v2699_v28 }
 0x134   :  { %2053 = vmatpush3.bf16.msra.mxu1 %v2732_v37 }
 0x135   :  { %741 = vmatpush1.bf16.msra.mxu0 %v2705_v30  ;;  %2054 = vmatprep.subr.bf16.mxu1 %v2539_v14 }
 0x136   :  { %742 = vmatprep.subr.bf16.mxu0 %v2708_v31 }
 0x138   :  { %2055 = vmatpush3.bf16.msra.mxu1 %v2746_v42 }
 0x139   :  { %743 = vmatpush1.bf16.msra.mxu0 %v2716_v33  ;;  %2056 = vmatprep.subr.bf16.mxu1 %v2539_v14 }
 0x13a   :  { %744 = vmatprep.subr.bf16.mxu0 %v2729_v36 }
 0x13c   :  { %2057 = vmatpush3.bf16.msra.mxu1 %v2766_v47 }
 0x13d   :  { %745 = vmatpush1.bf16.msra.mxu0 %v2739_v39  ;;  %2058 = vmatprep.subr.bf16.mxu1 %v2539_v14 }
 0x13e   :  { %746 = vmatprep.subr.bf16.mxu0 %v2743_v41 }
 0x140   :  { %2059 = vmatpush3.bf16.msra.mxu1 %v2775_v50 }
 0x141   :  { %747 = vmatpush1.bf16.msra.mxu0 %v2751_v43  ;;  %2060 = vmatprep.subr.bf16.mxu1 %v2539_v14 }
 0x142   :  { %886 = vmatprep.subr.bf16.mxu0 %v2668_v19 }
 0x144   :  { %2061 = vmatpush3.bf16.msra.mxu1 %v2784_v52 }
 0x145   :  { %2066 = vmatprep.subr.bf16.mxu1 %v2539_v14 }
 0x1e4   :  { %v605_v3 = vpop.f32.mrf.mxu0 }
 0x1e5   :  { %v655_v4 = vadd.f32 %v605_v3, %v404_v1  ;;  %v409_v1 = vunpack.c.h.bf16 %v401_v56 }
 0x1e6   :  { %v607_v6 = vpop.f32.mrf.mxu0 }
 0x1e7   :  { %v1887_v7 = vmul.f32 -1.442695, %v655_v4  ;;  %v669_v12 = vadd.f32 %v607_v6, %v405_v8  ;;  %v648_v17 = vpop.f32.mrf.mxu1 }
 0x1e8   :  { %v609_v9 = vpop.f32.mrf.mxu0  ;;  %v690_v59 = vadd.f32 %v2847_v55, %v648_v17 }
 0x1e9   :  { %2252 = vpow2.f32 %v1887_v7  ;;  %v656_v10 = vadd.f32 %v609_v9, %v407_v5  ;;  %v1889_v34 = vmul.f32 -1.442695, %v669_v12  ;;  %v2044_v35 = vpop.f32.mrf.mxu1 }
 0x1ea   :  { %v611_v16 = vpop.f32.mrf.mxu0 }
 0x1eb   :  { %v1888_v15 = vmul.f32 -1.442695, %v656_v10  ;;  %v670_v18 = vadd.f32 %v611_v16, %v408_v11  ;;  %v651_v38 = vpop.f32.mrf.mxu1  ;;  %v712_v11 = vpop.permute.xlu0 %711 }
 0x1ec   :  { %v691_v2 = vadd.f32 %v2847_v55, %v651_v38  ;;  %vm716_vm3 = vcmp.eq.s32.totalorder %v712_v11, 1 }
 0x1ed   :  { %2254 = vpow2.f32 %v1888_v15  ;;  %v1890_v40 = vmul.f32 -1.442695, %v670_v18  ;;  %v2045_v46 = vpop.f32.mrf.mxu1 }
 0x1ee   :  { %2256 = vpow2.f32 %v1889_v34 }
 0x1ef   :  { %2258 = vpow2.f32 %v1890_v40  ;;  %v715_v38 = vpop.permute.xlu0 %714 }
 0x1f0   :  { %vm717_vm4 = vcmp.eq.s32.totalorder %v715_v38, 1 }
 0x1f6   :  { %v2253_v48 = vpop.eup %2252 }
 0x1f7   :  { %v663_v49 = vadd.f32 1.0, %v2253_v48 }
 0x1f9   :  { %2260 = vrcp.f32 %v663_v49  ;;  %v723_v49 = vld [vmem:[#allocation2 + $0x24] sm:$0xff] }
 0x1fa   :  { %v2255_v51 = vpop.eup %2254  ;;  %v728_v56 = vunpack.c.l.bf16 %v723_v49 }
 0x1fb   :  { %v664_v53 = vadd.f32 1.0, %v2255_v51  ;;  %v2257_v54 = vpop.eup %2256 }
 0x1fc   :  { %v2259_v57 = vpop.eup %2258  ;;  %v677_v58 = vadd.f32 1.0, %v2257_v54 }
 0x1fd   :  { %2262 = vrcp.f32 %v664_v53  ;;  %v678_v62 = vadd.f32 1.0, %v2259_v57 }
 0x1fe   :  { %2264 = vrcp.f32 %v677_v58 }
 0x1ff   :  { %2266 = vrcp.f32 %v678_v62 }
 0x206   :  { %v2261_v61 = vpop.eup %2260 }
 0x207   :  { %v692_v63 = vmul.f32 %v2261_v61, %v690_v59 }
 0x209   :  { %v694_v0 = vadd.f32 %v692_v63, %v406_v60 }
 0x20a   :  { %v2263_v3 = vpop.eup %2262 }
 0x20b   :  { %2268 = vtanh.f32 %v694_v0  ;;  %v693_v4 = vmul.f32 %v2263_v3, %v691_v2  ;;  %v2265_v6 = vpop.eup %2264  ;;  %v729_v0 = vunpack.c.h.bf16 %v723_v49 }
 0x20c   :  { %v2267_v7 = vpop.eup %2266  ;;  %v698_v8 = vsub.f32 1.0, %v2265_v6  ;;  %v702_v12 = vmul.f32 %v2265_v6, %v2756_v44 }
 0x20d   :  { %v695_v5 = vadd.f32 %v693_v4, %v409_v1  ;;  %v699_v15 = vsub.f32 1.0, %v2267_v7  ;;  %v703_v34 = vmul.f32 %v2267_v7, %v2761_v45 }
 0x20f   :  { %2270 = vtanh.f32 %v695_v5 }
 0x218   :  { %v2269_v9 = vpop.eup %2268 }
 0x219   :  { %v700_v10 = vmul.f32 %v2269_v9, %v698_v8 }
 0x21b   :  { %v704_v17 = vadd.f32 %v702_v12, %v700_v10 }
 0x21c   :  { %v2271_v16 = vpop.eup %2270 }
 0x21d   :  { %v701_v18 = vmul.f32 %v2271_v16, %v699_v15  ;;  %v2854_v40 = vsel %vm716_vm3, %v704_v17, %v2756_v44  ;;  %v721_v44 = vld [vmem:[#allocation2 + $0x18] sm:$0xff]  ;;  %v722_v15 = vld [vmem:[#allocation2 + $0x20] ss:$12 sps:$4 sm:$0xff]  }
 0x21e   :  { %v726_v60 = vunpack.c.h.bf16 %v721_v44 }
 0x21f   :  { %v705_v35 = vadd.f32 %v703_v34, %v701_v18  ;;  %v727_v18 = vunpack.c.l.bf16 %v722_v15 }
 0x221   :  { %v2857_v46 = vsel %vm717_vm4, %v705_v35, %v2761_v45  ;;  %v725_v45 = vunpack.c.l.bf16 %v721_v44 }
 0x222   :  { %v731_v48 = vpack.c.bf16 %v2857_v46, %v2854_v40 }
 0x224   :  { %765 = vmatmul.mubr.bf16.vlgmr.msra.gmra.mxu0 %v731_v48  ;;  %2063 = vmatmul.mubr.bf16.vlgmr.msra.gmra.mxu1 %v731_v48 }
 0x225   :  { %887 = vmatpush1.bf16.msra.mxu0 %v2670_v13  ;;  %2067 = vmatpush3.bf16.msra.mxu1 %v2693_v26 }
 0x226   :  { %888 = vmatprep.subr.bf16.mxu0 %v2675_v21  ;;  %2068 = vmatprep.subr.bf16.mxu1 %v2539_v14 }
 0x227   :  { %918 = vmatprep.mubr.bf16.mxu0 %v2540_v20  ;;  %2082 = vmatprep.mubr.msk.bf16.mxu1 %vm2541_vm1, %v2539_v14 }
 0x229   :  { %889 = vmatpush1.bf16.msra.mxu0 %v2680_v22  ;;  %2069 = vmatpush3.bf16.msra.mxu1 %v2702_v29 }
 0x22a   :  { %890 = vmatprep.subr.bf16.mxu0 %v2684_v23  ;;  %2070 = vmatprep.subr.bf16.mxu1 %v2539_v14 }
 0x22d   :  { %891 = vmatpush1.bf16.msra.mxu0 %v2688_v24  ;;  %2071 = vmatpush3.bf16.msra.mxu1 %v2712_v32 }
 0x22e   :  { %892 = vmatprep.subr.bf16.mxu0 %v2691_v25  ;;  %2072 = vmatprep.subr.bf16.mxu1 %v2539_v14 }
 0x231   :  { %893 = vmatpush1.bf16.msra.mxu0 %v2696_v27  ;;  %2073 = vmatpush3.bf16.msra.mxu1 %v2732_v37 }
 0x232   :  { %894 = vmatprep.subr.bf16.mxu0 %v2699_v28  ;;  %2074 = vmatprep.subr.bf16.mxu1 %v2539_v14 }
 0x235   :  { %895 = vmatpush1.bf16.msra.mxu0 %v2705_v30  ;;  %2075 = vmatpush3.bf16.msra.mxu1 %v2746_v42 }
 0x236   :  { %896 = vmatprep.subr.bf16.mxu0 %v2708_v31  ;;  %2076 = vmatprep.subr.bf16.mxu1 %v2539_v14 }
 0x239   :  { %897 = vmatpush1.bf16.msra.mxu0 %v2716_v33  ;;  %2077 = vmatpush3.bf16.msra.mxu1 %v2766_v47 }
 0x23a   :  { %898 = vmatprep.subr.bf16.mxu0 %v2729_v36  ;;  %2078 = vmatprep.subr.bf16.mxu1 %v2539_v14 }
 0x23d   :  { %899 = vmatpush1.bf16.msra.mxu0 %v2739_v39  ;;  %2079 = vmatpush3.bf16.msra.mxu1 %v2775_v50 }
 0x23e   :  { %900 = vmatprep.subr.bf16.mxu0 %v2743_v41  ;;  %2080 = vmatprep.subr.bf16.mxu1 %v2539_v14 }
 0x241   :  { %901 = vmatpush1.bf16.msra.mxu0 %v2751_v43  ;;  %2081 = vmatpush3.bf16.msra.mxu1 %v2784_v52 }
 0x242   :  { %1040 = vmatprep.subr.bf16.mxu0 %v2668_v19  ;;  %2086 = vmatprep.subr.bf16.mxu1 %v2539_v14 }
 0x2e4   :  { %v766_v51 = vpop.f32.mrf.mxu0  ;;  %v809_v53 = vpop.f32.mrf.mxu1 }
 0x2e5   :  { %v816_v54 = vadd.f32 %v766_v51, %v725_v45  ;;  %v844_v34 = vadd.f32 %v2847_v55, %v809_v53  ;;  %v730_v45 = vunpack.c.h.bf16 %v722_v15 }
 0x2e6   :  { %v768_v57 = vpop.f32.mrf.mxu0  ;;  %v2064_v58 = vpop.f32.mrf.mxu1 }
 0x2e7   :  { %v1892_v59 = vmul.f32 -1.442695, %v816_v54  ;;  %v830_v2 = vadd.f32 %v768_v57, %v726_v60 }
 0x2e8   :  { %v770_v61 = vpop.f32.mrf.mxu0  ;;  %v812_v62 = vpop.f32.mrf.mxu1 }
 0x2e9   :  { %2272 = vpow2.f32 %v1892_v59  ;;  %v817_v63 = vadd.f32 %v770_v61, %v728_v56  ;;  %v1894_v6 = vmul.f32 -1.442695, %v830_v2  ;;  %v845_v49 = vadd.f32 %v2847_v55, %v812_v62  ;;  %v866_v61 = vpop.permute.xlu1 %865 }
 0x2ea   :  { %v2065_v1 = vpop.f32.mrf.mxu1  ;;  %v772_v4 = vpop.f32.mrf.mxu0  ;;  %vm870_vm5 = vcmp.eq.s32.totalorder %v866_v61, 1 }
 0x2eb   :  { %v1893_v3 = vmul.f32 -1.442695, %v817_v63  ;;  %v831_v5 = vadd.f32 %v772_v4, %v729_v0 }
 0x2ed   :  { %2274 = vpow2.f32 %v1893_v3  ;;  %v1895_v7 = vmul.f32 -1.442695, %v831_v5  ;;  %v869_v4 = vpop.permute.xlu1 %868 }
 0x2ee   :  { %2276 = vpow2.f32 %v1894_v6  ;;  %vm871_vm6 = vcmp.eq.s32.totalorder %v869_v4, 1 }
 0x2ef   :  { %2278 = vpow2.f32 %v1895_v7 }
 0x2f6   :  { %v2273_v8 = vpop.eup %2272 }
 0x2f7   :  { %v824_v9 = vadd.f32 1.0, %v2273_v8 }
 0x2f9   :  { %2280 = vrcp.f32 %v824_v9  ;;  %v877_v9 = vld [vmem:[#allocation2 + $0x3c] sm:$0xff] }
 0x2fa   :  { %v2275_v10 = vpop.eup %2274  ;;  %v882_v15 = vunpack.c.l.bf16 %v877_v9 }
 0x2fb   :  { %v825_v11 = vadd.f32 1.0, %v2275_v10  ;;  %v2277_v12 = vpop.eup %2276 }
 0x2fc   :  { %v2279_v16 = vpop.eup %2278  ;;  %v838_v17 = vadd.f32 1.0, %v2277_v12 }
 0x2fd   :  { %2282 = vrcp.f32 %v825_v11  ;;  %v839_v38 = vadd.f32 1.0, %v2279_v16 }
 0x2fe   :  { %2284 = vrcp.f32 %v838_v17 }
 0x2ff   :  { %2286 = vrcp.f32 %v839_v38 }
 0x306   :  { %v2281_v35 = vpop.eup %2280 }
 0x307   :  { %v846_v48 = vmul.f32 %v2281_v35, %v844_v34 }
 0x309   :  { %v848_v44 = vadd.f32 %v846_v48, %v727_v18 }
 0x30a   :  { %v2283_v51 = vpop.eup %2282 }
 0x30b   :  { %2288 = vtanh.f32 %v848_v44  ;;  %v847_v54 = vmul.f32 %v2283_v51, %v845_v49  ;;  %v2285_v57 = vpop.eup %2284  ;;  %v883_v44 = vunpack.c.h.bf16 %v877_v9 }
 0x30c   :  { %v2287_v58 = vpop.eup %2286  ;;  %v852_v59 = vsub.f32 1.0, %v2285_v57  ;;  %v856_v63 = vmul.f32 %v2285_v57, %v2854_v40 }
 0x30d   :  { %v849_v56 = vadd.f32 %v847_v54, %v730_v45  ;;  %v853_v0 = vsub.f32 1.0, %v2287_v58  ;;  %v857_v62 = vmul.f32 %v2287_v58, %v2857_v46 }
 0x30f   :  { %2290 = vtanh.f32 %v849_v56 }
 0x318   :  { %v2289_v60 = vpop.eup %2288 }
 0x319   :  { %v854_v53 = vmul.f32 %v2289_v60, %v852_v59 }
 0x31b   :  { %v858_v2 = vadd.f32 %v856_v63, %v854_v53 }
 0x31c   :  { %v2291_v1 = vpop.eup %2290 }
 0x31d   :  { %v855_v3 = vmul.f32 %v2291_v1, %v853_v0  ;;  %v2901_v6 = vsel %vm870_vm5, %v858_v2, %v2854_v40  ;;  %v875_v40 = vld [vmem:[#allocation2 + $0x30] sm:$0xff]  ;;  %v876_v0 = vld [vmem:[#allocation2 + $0x38] ss:$12 sps:$4 sm:$0xff]  }
 0x31e   :  { %v880_v34 = vunpack.c.h.bf16 %v875_v40 }
 0x31f   :  { %v859_v5 = vadd.f32 %v857_v62, %v855_v3  ;;  %v881_v3 = vunpack.c.l.bf16 %v876_v0 }
 0x321   :  { %v2904_v7 = vsel %vm871_vm6, %v859_v5, %v2857_v46  ;;  %v879_v46 = vunpack.c.l.bf16 %v875_v40 }
 0x322   :  { %v885_v8 = vpack.c.bf16 %v2904_v7, %v2901_v6 }
 0x324   :  { %919 = vmatmul.mubr.bf16.vlgmr.msra.gmra.mxu0 %v885_v8  ;;  %2083 = vmatmul.mubr.bf16.vlgmr.msra.gmra.mxu1 %v885_v8 }
 0x325   :  { %1041 = vmatpush1.bf16.msra.mxu0 %v2670_v13  ;;  %2087 = vmatpush3.bf16.msra.mxu1 %v2693_v26 }
 0x326   :  { %1042 = vmatprep.subr.bf16.mxu0 %v2675_v21  ;;  %2088 = vmatprep.subr.bf16.mxu1 %v2539_v14 }
 0x327   :  { %1072 = vmatprep.mubr.bf16.mxu0 %v2540_v20  ;;  %2102 = vmatprep.mubr.msk.bf16.mxu1 %vm2541_vm1, %v2539_v14 }
 0x329   :  { %1043 = vmatpush1.bf16.msra.mxu0 %v2680_v22  ;;  %2089 = vmatpush3.bf16.msra.mxu1 %v2702_v29 }
 0x32a   :  { %1044 = vmatprep.subr.bf16.mxu0 %v2684_v23  ;;  %2090 = vmatprep.subr.bf16.mxu1 %v2539_v14 }
 0x32d   :  { %1045 = vmatpush1.bf16.msra.mxu0 %v2688_v24  ;;  %2091 = vmatpush3.bf16.msra.mxu1 %v2712_v32 }
 0x32e   :  { %1046 = vmatprep.subr.bf16.mxu0 %v2691_v25  ;;  %2092 = vmatprep.subr.bf16.mxu1 %v2539_v14 }
 0x331   :  { %1047 = vmatpush1.bf16.msra.mxu0 %v2696_v27  ;;  %2093 = vmatpush3.bf16.msra.mxu1 %v2732_v37 }
 0x332   :  { %1048 = vmatprep.subr.bf16.mxu0 %v2699_v28  ;;  %2094 = vmatprep.subr.bf16.mxu1 %v2539_v14 }
 0x335   :  { %1049 = vmatpush1.bf16.msra.mxu0 %v2705_v30  ;;  %2095 = vmatpush3.bf16.msra.mxu1 %v2746_v42 }
 0x336   :  { %1050 = vmatprep.subr.bf16.mxu0 %v2708_v31  ;;  %2096 = vmatprep.subr.bf16.mxu1 %v2539_v14 }
 0x339   :  { %1051 = vmatpush1.bf16.msra.mxu0 %v2716_v33  ;;  %2097 = vmatpush3.bf16.msra.mxu1 %v2766_v47 }
 0x33a   :  { %1052 = vmatprep.subr.bf16.mxu0 %v2729_v36  ;;  %2098 = vmatprep.subr.bf16.mxu1 %v2539_v14 }
 0x33d   :  { %1053 = vmatpush1.bf16.msra.mxu0 %v2739_v39  ;;  %2099 = vmatpush3.bf16.msra.mxu1 %v2775_v50 }
 0x33e   :  { %1054 = vmatprep.subr.bf16.mxu0 %v2743_v41  ;;  %2100 = vmatprep.subr.bf16.mxu1 %v2539_v14 }
 0x341   :  { %1055 = vmatpush1.bf16.msra.mxu0 %v2751_v43  ;;  %2101 = vmatpush3.bf16.msra.mxu1 %v2784_v52 }
 0x342   :  { %1194 = vmatprep.subr.bf16.mxu0 %v2668_v19  ;;  %2106 = vmatprep.subr.bf16.mxu1 %v2539_v14 }
 0x3e4   :  { %v920_v10 = vpop.f32.mrf.mxu0  ;;  %v963_v11 = vpop.f32.mrf.mxu1 }
 0x3e5   :  { %v970_v12 = vadd.f32 %v920_v10, %v879_v46  ;;  %v998_v62 = vadd.f32 %v2847_v55, %v963_v11  ;;  %v884_v46 = vunpack.c.h.bf16 %v876_v0 }
 0x3e6   :  { %v922_v16 = vpop.f32.mrf.mxu0  ;;  %v2084_v17 = vpop.f32.mrf.mxu1 }
 0x3e7   :  { %v1896_v18 = vmul.f32 -1.442695, %v970_v12  ;;  %v984_v49 = vadd.f32 %v922_v16, %v880_v34 }
 0x3e8   :  { %v924_v35 = vpop.f32.mrf.mxu0  ;;  %v966_v38 = vpop.f32.mrf.mxu1 }
 0x3e9   :  { %2292 = vpow2.f32 %v1896_v18  ;;  %v971_v48 = vadd.f32 %v924_v35, %v882_v15  ;;  %v1898_v57 = vmul.f32 -1.442695, %v984_v49  ;;  %v999_v9 = vadd.f32 %v2847_v55, %v966_v38  ;;  %v1020_v38 = vpop.permute.xlu0 %1019 }
 0x3ea   :  { %v2085_v45 = vpop.f32.mrf.mxu1  ;;  %v926_v54 = vpop.f32.mrf.mxu0  ;;  %vm1024_vm7 = vcmp.eq.s32.totalorder %v1020_v38, 1 }
 0x3eb   :  { %v1897_v51 = vmul.f32 -1.442695, %v971_v48  ;;  %v985_v56 = vadd.f32 %v926_v54, %v883_v44  ;;  %v1023_v54 = vpop.permute.xlu1 %1022 }
 0x3ec   :  { %vm1025_vm8 = vcmp.eq.s32.totalorder %v1023_v54, 1 }
 0x3ed   :  { %2294 = vpow2.f32 %v1897_v51  ;;  %v1899_v58 = vmul.f32 -1.442695, %v985_v56  ;;  %v1174_v54 = vpop.permute.xlu0 %1173 }
 0x3ee   :  { %2296 = vpow2.f32 %v1898_v57  ;;  %vm1178_vm9 = vcmp.eq.s32.totalorder %v1174_v54, 1 }
 0x3ef   :  { %2298 = vpow2.f32 %v1899_v58 }
 0x3f6   :  { %v2293_v59 = vpop.eup %2292 }
 0x3f7   :  { %v978_v60 = vadd.f32 1.0, %v2293_v59 }
 0x3f9   :  { %2300 = vrcp.f32 %v978_v60 }
 0x3fa   :  { %v2295_v61 = vpop.eup %2294 }
 0x3fb   :  { %v979_v53 = vadd.f32 1.0, %v2295_v61  ;;  %v2297_v63 = vpop.eup %2296 }
 0x3fc   :  { %v2299_v1 = vpop.eup %2298  ;;  %v992_v2 = vadd.f32 1.0, %v2297_v63 }
 0x3fd   :  { %2302 = vrcp.f32 %v979_v53  ;;  %v993_v5 = vadd.f32 1.0, %v2299_v1  ;;  %v1030_v1 = vld [vmem:[#allocation2 + $0x50] ss:$12 sps:$4 sm:$0xff]  }
 0x3fe   :  { %2304 = vrcp.f32 %v992_v2 }
 0x3ff   :  { %2306 = vrcp.f32 %v993_v5 }
 0x406   :  { %v2301_v4 = vpop.eup %2300 }
 0x407   :  { %v1000_v8 = vmul.f32 %v2301_v4, %v998_v62  ;;  %v1035_v62 = vunpack.c.l.bf16 %v1030_v1 }
 0x409   :  { %v1002_v40 = vadd.f32 %v1000_v8, %v881_v3 }
 0x40a   :  { %v2303_v10 = vpop.eup %2302 }
 0x40b   :  { %2308 = vtanh.f32 %v1002_v40  ;;  %v1001_v12 = vmul.f32 %v2303_v10, %v999_v9  ;;  %v2305_v16 = vpop.eup %2304  ;;  %v1038_v9 = vunpack.c.h.bf16 %v1030_v1 }
 0x40c   :  { %v2307_v17 = vpop.eup %2306  ;;  %v1006_v18 = vsub.f32 1.0, %v2305_v16  ;;  %v1010_v48 = vmul.f32 %v2305_v16, %v2901_v6 }
 0x40d   :  { %v1003_v15 = vadd.f32 %v1001_v12, %v884_v46  ;;  %v1007_v11 = vsub.f32 1.0, %v2307_v17  ;;  %v1011_v49 = vmul.f32 %v2307_v17, %v2904_v7 }
 0x40f   :  { %2310 = vtanh.f32 %v1003_v15 }
 0x418   :  { %v2309_v34 = vpop.eup %2308 }
 0x419   :  { %v1008_v35 = vmul.f32 %v2309_v34, %v1006_v18 }
 0x41b   :  { %v1012_v51 = vadd.f32 %v1010_v48, %v1008_v35 }
 0x41c   :  { %v2311_v44 = vpop.eup %2310 }
 0x41d   :  { %v1009_v45 = vmul.f32 %v2311_v44, %v1007_v11  ;;  %v2948_v57 = vsel %vm1024_vm7, %v1012_v51, %v2901_v6 }
 0x41f   :  { %v1013_v56 = vadd.f32 %v1011_v49, %v1009_v45 }
 0x421   :  { %v2951_v58 = vsel %vm1025_vm8, %v1013_v56, %v2904_v7  ;;  %v1177_v56 = vpop.permute.xlu1 %1176 }
 0x422   :  { %v1039_v59 = vpack.c.bf16 %v2951_v58, %v2948_v57  ;;  %vm1179_vm10 = vcmp.eq.s32.totalorder %v1177_v56, 1 }
 0x424   :  { %1073 = vmatmul.mubr.bf16.vlgmr.msra.gmra.mxu0 %v1039_v59  ;;  %2103 = vmatmul.mubr.bf16.vlgmr.msra.gmra.mxu1 %v1039_v59 }
 0x425   :  { %1195 = vmatpush1.bf16.msra.mxu0 %v2670_v13  ;;  %2107 = vmatpush3.bf16.msra.mxu1 %v2693_v26  ;;  %v1029_v13 = vld [vmem:[#allocation2 + $0x48] sm:$0xff] }
 0x426   :  { %1196 = vmatprep.subr.bf16.mxu0 %v2675_v21  ;;  %2108 = vmatprep.subr.bf16.mxu1 %v2539_v14  ;;  %v1033_v21 = vunpack.c.l.bf16 %v1029_v13 }
 0x427   :  { %1226 = vmatprep.mubr.bf16.mxu0 %v2540_v20  ;;  %2122 = vmatprep.mubr.msk.bf16.mxu1 %vm2541_vm1, %v2539_v14 }
 0x429   :  { %1197 = vmatpush1.bf16.msra.mxu0 %v2680_v22  ;;  %2109 = vmatpush3.bf16.msra.mxu1 %v2702_v29  ;;  %v1031_v22 = vld [vmem:[#allocation2 + $0x54] sm:$0xff] }
 0x42a   :  { %1198 = vmatprep.subr.bf16.mxu0 %v2684_v23  ;;  %2110 = vmatprep.subr.bf16.mxu1 %v2539_v14  ;;  %v1036_v26 = vunpack.c.l.bf16 %v1031_v22 }
 0x42d   :  { %1199 = vmatpush1.bf16.msra.mxu0 %v2688_v24  ;;  %2111 = vmatpush3.bf16.msra.mxu1 %v2712_v32 }
 0x42e   :  { %1200 = vmatprep.subr.bf16.mxu0 %v2691_v25  ;;  %2112 = vmatprep.subr.bf16.mxu1 %v2539_v14 }
 0x431   :  { %1201 = vmatpush1.bf16.msra.mxu0 %v2696_v27  ;;  %2113 = vmatpush3.bf16.msra.mxu1 %v2732_v37 }
 0x432   :  { %1202 = vmatprep.subr.bf16.mxu0 %v2699_v28  ;;  %2114 = vmatprep.subr.bf16.mxu1 %v2539_v14 }
 0x435   :  { %1203 = vmatpush1.bf16.msra.mxu0 %v2705_v30  ;;  %2115 = vmatpush3.bf16.msra.mxu1 %v2746_v42  ;;  %v1034_v30 = vunpack.c.h.bf16 %v1029_v13 }
 0x436   :  { %1204 = vmatprep.subr.bf16.mxu0 %v2708_v31  ;;  %2116 = vmatprep.subr.bf16.mxu1 %v2539_v14 }
 0x439   :  { %1205 = vmatpush1.bf16.msra.mxu0 %v2716_v33  ;;  %2117 = vmatpush3.bf16.msra.mxu1 %v2766_v47 }
 0x43a   :  { %1206 = vmatprep.subr.bf16.mxu0 %v2729_v36  ;;  %2118 = vmatprep.subr.bf16.mxu1 %v2539_v14  ;;  %v1037_v36 = vunpack.c.h.bf16 %v1031_v22 }
 0x43d   :  { %1207 = vmatpush1.bf16.msra.mxu0 %v2739_v39  ;;  %2119 = vmatpush3.bf16.msra.mxu1 %v2775_v50 }
 0x43e   :  { %1208 = vmatprep.subr.bf16.mxu0 %v2743_v41  ;;  %2120 = vmatprep.subr.bf16.mxu1 %v2539_v14 }
 0x441   :  { %1209 = vmatpush1.bf16.msra.mxu0 %v2751_v43  ;;  %2121 = vmatpush3.bf16.msra.mxu1 %v2784_v52 }
 0x442   :  { %1348 = vmatprep.subr.bf16.mxu0 %v2668_v19  ;;  %2126 = vmatprep.subr.bf16.mxu1 %v2539_v14 }
 0x4e4   :  { %v1074_v23 = vpop.f32.mrf.mxu0  ;;  %v1117_v24 = vpop.f32.mrf.mxu1 }
 0x4e5   :  { %v1124_v25 = vadd.f32 %v1074_v23, %v1033_v21  ;;  %v1152_v4 = vadd.f32 %v2847_v55, %v1117_v24  ;;  %v3002_v23 = vld [vmem:[#allocation10 + $0xa8] ss:$12 sps:$4 sm:$0xff]   ;;  %v3005_v24 = vld [vmem:[#allocation10 + $0xb0] ss:$12 sps:$4 sm:$0xff]  }
 0x4e6   :  { %v1076_v27 = vpop.f32.mrf.mxu0  ;;  %v2104_v28 = vpop.f32.mrf.mxu1 }
 0x4e7   :  { %v1900_v29 = vmul.f32 -1.442695, %v1124_v25  ;;  %v1138_v19 = vadd.f32 %v1076_v27, %v1034_v30  ;;  %v3008_v25 = vld [vmem:[#allocation10 + $0x94] ss:$12 sps:$4 sm:$0xff]   ;;  %v3025_v27 = vld [vmem:[#allocation10 + $0x78] ss:$12 sps:$4 sm:$0xff]  }
 0x4e8   :  { %v1078_v31 = vpop.f32.mrf.mxu0  ;;  %v1120_v32 = vpop.f32.mrf.mxu1  ;;  %v3028_v28 = vld [vmem:[#allocation10 + $0x80] ss:$12 sps:$4 sm:$0xff]  }
 0x4e9   :  { %2312 = vpow2.f32 %v1900_v29  ;;  %v1125_v33 = vadd.f32 %v1078_v31, %v1036_v26  ;;  %v1902_v6 = vmul.f32 -1.442695, %v1138_v19  ;;  %v1153_v10 = vadd.f32 %v2847_v55, %v1120_v32  ;;  %v3021_v26 = vld [vmem:[#allocation10 + $0x7c] ss:$12 sps:$4 sm:$0xff]   ;;  %v3031_v29 = vld [vmem:[#allocation10 + $0x64] ss:$12 sps:$4 sm:$0xff]  }
 0x4ea   :  { %v2105_v37 = vpop.f32.mrf.mxu1  ;;  %v1080_v41 = vpop.f32.mrf.mxu0  ;;  %v3035_v30 = vld [vmem:[#allocation10 + $0x60] ss:$12 sps:$4 sm:$0xff]   ;;  %v3038_v31 = vld [vmem:[#allocation10 + $0x68] ss:$12 sps:$4 sm:$0xff]  }
 0x4eb   :  { %v1901_v39 = vmul.f32 -1.442695, %v1125_v33  ;;  %v1139_v43 = vadd.f32 %v1080_v41, %v1037_v36  ;;  %v3041_v32 = vld [vmem:[#allocation10 + $0x4c] ss:$12 sps:$4 sm:$0xff]   ;;  %v3045_v33 = vld [vmem:[#allocation10 + $0x48] ss:$12 sps:$4 sm:$0xff]  }
 0x4ec   :  { %v3049_v36 = vld [vmem:[#allocation10 + $0x34] ss:$12 sps:$4 sm:$0xff]   ;;  %v3053_v37 = vld [vmem:[#allocation10 + $0x30] ss:$12 sps:$4 sm:$0xff]  }
 0x4ed   :  { %2314 = vpow2.f32 %v1901_v39  ;;  %v1903_v7 = vmul.f32 -1.442695, %v1139_v43  ;;  %v3057_v19 = vld [vmem:[#allocation10 + $0x1c] ss:$12 sps:$4 sm:$0xff]   ;;  %v3061_v39 = vld [vmem:[#allocation10 + $0x18] ss:$12 sps:$4 sm:$0xff]  }
 0x4ee   :  { %2316 = vpow2.f32 %v1902_v6  ;;  %v3069_v41 = vld [vmem:[#allocation10] ss:$12 sps:$4 sm:$0xff]   ;;  %v1185_v6 = vld [vmem:[#allocation2 + $0x6c] sm:$0xff] }
 0x4ef   :  { %2318 = vpow2.f32 %v1903_v7  ;;  %v1183_v43 = vld [vmem:[#allocation2 + $0x60] sm:$0xff] }
 0x4f6   :  { %v2313_v60 = vpop.eup %2312 }
 0x4f7   :  { %v1132_v61 = vadd.f32 1.0, %v2313_v60 }
 0x4f9   :  { %2320 = vrcp.f32 %v1132_v61 }
 0x4fa   :  { %v2315_v53 = vpop.eup %2314 }
 0x4fb   :  { %v1133_v63 = vadd.f32 1.0, %v2315_v53  ;;  %v2317_v0 = vpop.eup %2316  ;;  %v1190_v53 = vunpack.c.l.bf16 %v1185_v6 }
 0x4fc   :  { %v2319_v2 = vpop.eup %2318  ;;  %v1146_v3 = vadd.f32 1.0, %v2317_v0 }
 0x4fd   :  { %2322 = vrcp.f32 %v1133_v63  ;;  %v1147_v8 = vadd.f32 1.0, %v2319_v2  ;;  %v1188_v2 = vunpack.c.h.bf16 %v1183_v43 }
 0x4fe   :  { %2324 = vrcp.f32 %v1146_v3 }
 0x4ff   :  { %2326 = vrcp.f32 %v1147_v8 }
 0x506   :  { %v2321_v5 = vpop.eup %2320 }
 0x507   :  { %v1154_v40 = vmul.f32 %v2321_v5, %v1152_v4  ;;  %v1191_v4 = vunpack.c.h.bf16 %v1185_v6 }
 0x509   :  { %v1156_v46 = vadd.f32 %v1154_v40, %v1035_v62 }
 0x50a   :  { %v2323_v12 = vpop.eup %2322 }
 0x50b   :  { %2328 = vtanh.f32 %v1156_v46  ;;  %v1155_v15 = vmul.f32 %v2323_v12, %v1153_v10  ;;  %v2325_v17 = vpop.eup %2324 }
 0x50c   :  { %v2327_v18 = vpop.eup %2326  ;;  %v1160_v34 = vsub.f32 1.0, %v2325_v17  ;;  %v1164_v44 = vmul.f32 %v2325_v17, %v2948_v57 }
 0x50d   :  { %v1157_v16 = vadd.f32 %v1155_v15, %v1038_v9  ;;  %v1161_v48 = vsub.f32 1.0, %v2327_v18  ;;  %v1165_v51 = vmul.f32 %v2327_v18, %v2951_v58 }
 0x50f   :  { %2330 = vtanh.f32 %v1157_v16 }
 0x518   :  { %v2329_v35 = vpop.eup %2328 }
 0x519   :  { %v1162_v11 = vmul.f32 %v2329_v35, %v1160_v34  ;;  %v1184_v35 = vld [vmem:[#allocation2 + $0x68] ss:$12 sps:$4 sm:$0xff]  }
 0x51a   :  { %v1192_v56 = vunpack.c.h.bf16 %v1184_v35 }
 0x51b   :  { %v1166_v38 = vadd.f32 %v1164_v44, %v1162_v11  ;;  %v1189_v44 = vunpack.c.l.bf16 %v1184_v35 }
 0x51c   :  { %v2331_v45 = vpop.eup %2330 }
 0x51d   :  { %v1163_v49 = vmul.f32 %v2331_v45, %v1161_v48  ;;  %v2995_v13 = vsel %vm1178_vm9, %v1166_v38, %v2948_v57  ;;  %v3015_v57 = vld [vmem:[#allocation10 + $0x90] ss:$12 sps:$4 sm:$0xff]  }
 0x51f   :  { %v1167_v59 = vadd.f32 %v1165_v51, %v1163_v49 }
 0x521   :  { %v2998_v21 = vsel %vm1179_vm10, %v1167_v59, %v2951_v58  ;;  %v3018_v58 = vld [vmem:[#allocation10 + $0x98] ss:$12 sps:$4 sm:$0xff]  }
 0x522   :  { %v1193_v22 = vpack.c.bf16 %v2998_v21, %v2995_v13 }
 0x524   :  { %1227 = vmatmul.mubr.bf16.vlgmr.msra.gmra.mxu0 %v1193_v22  ;;  %2123 = vmatmul.mubr.bf16.vlgmr.msra.gmra.mxu1 %v1193_v22 }
 0x525   :  { %1349 = vmatpush1.bf16.msra.mxu0 %v3002_v23  ;;  %2127 = vmatpush3.bf16.msra.mxu1 %v3005_v24 }
 0x526   :  { %1350 = vmatprep.subr.bf16.mxu0 %v3008_v25  ;;  %2128 = vmatprep.subr.bf16.mxu1 %v2539_v14 }
 0x527   :  { %1380 = vmatprep.mubr.bf16.mxu0 %v2540_v20  ;;  %2142 = vmatprep.mubr.msk.bf16.mxu1 %vm2541_vm1, %v2539_v14 }
 0x529   :  { %1351 = vmatpush1.bf16.msra.mxu0 %v3015_v57  ;;  %2129 = vmatpush3.bf16.msra.mxu1 %v3018_v58 }
 0x52a   :  { %1352 = vmatprep.subr.bf16.mxu0 %v3021_v26  ;;  %2130 = vmatprep.subr.bf16.mxu1 %v2539_v14 }
 0x52d   :  { %1353 = vmatpush1.bf16.msra.mxu0 %v3025_v27  ;;  %2131 = vmatpush3.bf16.msra.mxu1 %v3028_v28 }
 0x52e   :  { %1354 = vmatprep.subr.bf16.mxu0 %v3031_v29  ;;  %2132 = vmatprep.subr.bf16.mxu1 %v2539_v14 }
 0x531   :  { %1355 = vmatpush1.bf16.msra.mxu0 %v3035_v30  ;;  %2133 = vmatpush3.bf16.msra.mxu1 %v3038_v31 }
 0x532   :  { %1356 = vmatprep.subr.bf16.mxu0 %v3041_v32  ;;  %2134 = vmatprep.subr.bf16.mxu1 %v2539_v14 }
 0x535   :  { %1357 = vmatpush1.bf16.msra.mxu0 %v3045_v33  ;;  %2135 = vmatpush3.bf16.msra.mxu1 %v2746_v42  ;;  %v3065_v42 = vld [vmem:[#allocation10 + $0x4] ss:$12 sps:$4 sm:$0xff]  }
 0x536   :  { %1358 = vmatprep.subr.bf16.mxu0 %v3049_v36  ;;  %2136 = vmatprep.subr.bf16.mxu1 %v2539_v14 }
 0x539   :  { %1359 = vmatpush1.bf16.msra.mxu0 %v3053_v37  ;;  %2137 = vmatpush3.bf16.msra.mxu1 %v2766_v47  ;;  %v3073_v47 = vld [vmem:[#allocation10 + $0xac] ss:$12 sps:$4 sm:$0xff]  }
 0x53a   :  { %1360 = vmatprep.subr.bf16.mxu0 %v3057_v19  ;;  %2138 = vmatprep.subr.bf16.mxu1 %v2539_v14 }
 0x53d   :  { %1361 = vmatpush1.bf16.msra.mxu0 %v3061_v39  ;;  %2139 = vmatpush3.bf16.msra.mxu1 %v2775_v50  ;;  %v1187_v50 = vunpack.c.l.bf16 %v1183_v43 }
 0x53e   :  { %1362 = vmatprep.subr.bf16.mxu0 %v3065_v42  ;;  %2140 = vmatprep.subr.bf16.mxu1 %v2539_v14 }
 0x541   :  { %1363 = vmatpush1.bf16.msra.mxu0 %v3069_v41  ;;  %2141 = vmatpush3.bf16.msra.mxu1 %v2784_v52 }
 0x542   :  { %1502 = vmatprep.subr.bf16.mxu0 %v3073_v47  ;;  %2146 = vmatprep.subr.bf16.mxu1 %v2539_v14 }
 0x5e4   :  { %v1228_v7 = vpop.f32.mrf.mxu0  ;;  %v1271_v60 = vpop.f32.mrf.mxu1 }
 0x5e5   :  { %v1278_v61 = vadd.f32 %v1228_v7, %v1187_v50  ;;  %v1306_v45 = vadd.f32 %v2847_v55, %v1271_v60 }
 0x5e6   :  { %v1230_v63 = vpop.f32.mrf.mxu0  ;;  %v2124_v0 = vpop.f32.mrf.mxu1 }
 0x5e7   :  { %v1904_v1 = vmul.f32 -1.442695, %v1278_v61  ;;  %v1292_v8 = vadd.f32 %v1230_v63, %v1188_v2 }
 0x5e8   :  { %v1232_v3 = vpop.f32.mrf.mxu0  ;;  %v1274_v62 = vpop.f32.mrf.mxu1 }
 0x5e9   :  { %2332 = vpow2.f32 %v1904_v1  ;;  %v1279_v52 = vadd.f32 %v1232_v3, %v1190_v53  ;;  %v1906_v10 = vmul.f32 -1.442695, %v1292_v8  ;;  %v1307_v59 = vadd.f32 %v2847_v55, %v1274_v62  ;;  %v1328_v55 = vpop.permute.xlu0 %1327  ;;  %v1331_v62 = vpop.permute.xlu1 %1330 }
 0x5ea   :  { %v2125_v5 = vpop.f32.mrf.mxu1  ;;  %v1234_v46 = vpop.f32.mrf.mxu0  ;;  %vm1332_vm11 = vcmp.eq.s32.totalorder %v1328_v55, 1  ;;  %vm1333_vm12 = vcmp.eq.s32.totalorder %v1331_v62, 1 }
 0x5eb   :  { %v1905_v40 = vmul.f32 -1.442695, %v1279_v52  ;;  %v1293_v9 = vadd.f32 %v1234_v46, %v1191_v4  ;;  %v3121_v46 = vld [vmem:[#allocation10 + $0x20] ss:$12 sps:$4 sm:$0xff]  }
 0x5ed   :  { %2334 = vpow2.f32 %v1905_v40  ;;  %v1907_v12 = vmul.f32 -1.442695, %v1293_v9  ;;  %v3127_v9 = vld [vmem:[#allocation10 + $0x8] ss:$12 sps:$4 sm:$0xff]  }
 0x5ee   :  { %2336 = vpow2.f32 %v1906_v10  ;;  %v1337_v10 = vld [vmem:[#allocation2 + $0x78] sm:$0xff] }
 0x5ef   :  { %2338 = vpow2.f32 %v1907_v12  ;;  %v1341_v12 = vunpack.c.l.bf16 %v1337_v10 }
 0x5f6   :  { %v2333_v15 = vpop.eup %2332 }
 0x5f7   :  { %v1286_v16 = vadd.f32 1.0, %v2333_v15  ;;  %v1339_v15 = vld [vmem:[#allocation2 + $0x84] sm:$0xff] }
 0x5f9   :  { %2340 = vrcp.f32 %v1286_v16 }
 0x5fa   :  { %v2335_v17 = vpop.eup %2334 }
 0x5fb   :  { %v1287_v18 = vadd.f32 1.0, %v2335_v17  ;;  %v2337_v34 = vpop.eup %2336 }
 0x5fc   :  { %v2339_v11 = vpop.eup %2338  ;;  %v1300_v48 = vadd.f32 1.0, %v2337_v34  ;;  %v1344_v34 = vunpack.c.l.bf16 %v1339_v15 }
 0x5fd   :  { %2342 = vrcp.f32 %v1287_v18  ;;  %v1301_v51 = vadd.f32 1.0, %v2339_v11 }
 0x5fe   :  { %2344 = vrcp.f32 %v1300_v48 }
 0x5ff   :  { %2346 = vrcp.f32 %v1301_v51 }
 0x606   :  { %v2341_v49 = vpop.eup %2340 }
 0x607   :  { %v1308_v38 = vmul.f32 %v2341_v49, %v1306_v45 }
 0x609   :  { %v1310_v54 = vadd.f32 %v1308_v38, %v1189_v44  ;;  %v1342_v44 = vunpack.c.h.bf16 %v1337_v10  ;;  %v1345_v38 = vunpack.c.h.bf16 %v1339_v15 }
 0x60a   :  { %v2343_v22 = vpop.eup %2342 }
 0x60b   :  { %2348 = vtanh.f32 %v1310_v54  ;;  %v1309_v43 = vmul.f32 %v2343_v22, %v1307_v59  ;;  %v2345_v6 = vpop.eup %2344 }
 0x60c   :  { %v2347_v7 = vpop.eup %2346  ;;  %v1314_v61 = vsub.f32 1.0, %v2345_v6  ;;  %v1318_v0 = vmul.f32 %v2345_v6, %v2995_v13 }
 0x60d   :  { %v1311_v50 = vadd.f32 %v1309_v43, %v1192_v56  ;;  %v1315_v60 = vsub.f32 1.0, %v2347_v7  ;;  %v1319_v3 = vmul.f32 %v2347_v7, %v2998_v21 }
 0x60f   :  { %2350 = vtanh.f32 %v1311_v50 }
 0x618   :  { %v2349_v53 = vpop.eup %2348 }
 0x619   :  { %v1316_v63 = vmul.f32 %v2349_v53, %v1314_v61 }
 0x61b   :  { %v1320_v52 = vadd.f32 %v1318_v0, %v1316_v63 }
 0x61c   :  { %v2351_v1 = vpop.eup %2350 }
 0x61d   :  { %v1317_v2 = vmul.f32 %v2351_v1, %v1315_v60  ;;  %v3082_v5 = vsel %vm1332_vm11, %v1320_v52, %v2995_v13  ;;  %v3109_v13 = vld [vmem:[#allocation10 + $0x50] ss:$12 sps:$4 sm:$0xff]   ;;  %v1338_v60 = vld [vmem:[#allocation2 + $0x80] ss:$12 sps:$4 sm:$0xff]  }
 0x61e   :  { %v1346_v10 = vunpack.c.h.bf16 %v1338_v60 }
 0x61f   :  { %v1321_v4 = vadd.f32 %v1319_v3, %v1317_v2  ;;  %v1343_v2 = vunpack.c.l.bf16 %v1338_v60  ;;  %v3135_v3 = vld [vmem:[%s3209_s6] ss:$0 sm:$0xff]  ;;  %s2542_s6 = smov [#allocation11]  }
 0x620   :  { %s1805_s13 = sshll.u32 %s2542_s6, 4  ;;  %s1806_s13 = int_to_ptr.vmem [resolvable:$true] %s1805_s13 }
 0x621   :  { %v3085_v8 = vsel %vm1333_vm12, %v1321_v4, %v2998_v21  ;;  %v3115_v21 = vld [vmem:[#allocation10 + $0x38] ss:$12 sps:$4 sm:$0xff]   ;;  %s2497_s14 = scalar_lea.vmem %s1806_s13, 256  ;;  %p2502_p3 = scmp.lt.s32.totalorder %s1806_s13, %s1806_s13 }
 0x622   :  { %v1347_v40 = vpack.c.bf16 %v3085_v8, %v3082_v5  ;;  %p2498_p2 = scmp.ne.s32.totalorder %s1806_s13, %s2497_s14  ;;  %p2503_p4 = scmp.lt.s32.totalorder %s2497_s14, %s2497_s14 }
 0x624   :  { %1381 = vmatmul.mubr.bf16.vlgmr.msra.gmra.mxu0 %v1347_v40  ;;  %2143 = vmatmul.mubr.bf16.vlgmr.msra.gmra.mxu1 %v1347_v40  ;;  %p2504_p5 = por %p2503_p4, %p2502_p3 }
 0x625   :  { %1503 = vmatpush1.bf16.msra.mxu0 %v3002_v23  ;;  %2147 = vmatpush3.bf16.msra.mxu1 %v3005_v24 }
 0x626   :  { %1504 = vmatprep.subr.bf16.mxu0 %v3008_v25  ;;  %2148 = vmatprep.subr.bf16.mxu1 %v2539_v14  ;;  %p2505_p6 = pnand %p2504_p5, %p2498_p2 }
 0x627   :  { %1534 = vmatprep.mubr.bf16.mxu0 %v2540_v20  ;;  %2162 = vmatprep.mubr.msk.bf16.mxu1 %vm2541_vm1, %v2539_v14 }
 0x629   :  { %1505 = vmatpush1.bf16.msra.mxu0 %v3015_v57  ;;  %2149 = vmatpush3.bf16.msra.mxu1 %v3018_v58 }
 0x62a   :  { %1506 = vmatprep.subr.bf16.mxu0 %v3021_v26  ;;  %2150 = vmatprep.subr.bf16.mxu1 %v2539_v14 }
 0x62d   :  { %1507 = vmatpush1.bf16.msra.mxu0 %v3025_v27  ;;  %2151 = vmatpush3.bf16.msra.mxu1 %v3028_v28 }
 0x62e   :  { %1508 = vmatprep.subr.bf16.mxu0 %v3031_v29  ;;  %2152 = vmatprep.subr.bf16.mxu1 %v2539_v14 }
 0x631   :  { %1509 = vmatpush1.bf16.msra.mxu0 %v3035_v30  ;;  %2153 = vmatpush3.bf16.msra.mxu1 %v3038_v31 }
 0x632   :  { %1510 = vmatprep.subr.bf16.mxu0 %v3041_v32  ;;  %2154 = vmatprep.subr.bf16.mxu1 %v2539_v14 }
 0x635   :  { %1511 = vmatpush1.bf16.msra.mxu0 %v3045_v33  ;;  %2155 = vmatpush3.bf16.msra.mxu1 %v3109_v13 }
 0x636   :  { %1512 = vmatprep.subr.bf16.mxu0 %v3049_v36  ;;  %2156 = vmatprep.subr.bf16.mxu1 %v2539_v14 }
 0x639   :  { %1513 = vmatpush1.bf16.msra.mxu0 %v3053_v37  ;;  %2157 = vmatpush3.bf16.msra.mxu1 %v3115_v21 }
 0x63a   :  { %1514 = vmatprep.subr.bf16.mxu0 %v3057_v19  ;;  %2158 = vmatprep.subr.bf16.mxu1 %v2539_v14 }
 0x63d   :  { %1515 = vmatpush1.bf16.msra.mxu0 %v3061_v39  ;;  %2159 = vmatpush3.bf16.msra.mxu1 %v3121_v46 }
 0x63e   :  { %1516 = vmatprep.subr.bf16.mxu0 %v3065_v42  ;;  %2160 = vmatprep.subr.bf16.mxu1 %v2539_v14 }
 0x641   :  { %1517 = vmatpush1.bf16.msra.mxu0 %v3069_v41  ;;  %2161 = vmatpush3.bf16.msra.mxu1 %v3127_v9 }
 0x642   :  { %1656 = vmatprep.subr.bf16.mxu0 %v3073_v47  ;;  %2166 = vmatprep.subr.bf16.mxu1 %v2539_v14 }
 0x6e4   :  { %v1382_v16 = vpop.f32.mrf.mxu0  ;;  %v1425_v17 = vpop.f32.mrf.mxu1 }
 0x6e5   :  { %v1432_v18 = vadd.f32 %v1382_v16, %v1341_v12  ;;  %v1460_v52 = vadd.f32 %v3135_v3, %v1425_v17 }
 0x6e6   :  { %v1384_v35 = vpop.f32.mrf.mxu0  ;;  %v2144_v11 = vpop.f32.mrf.mxu1 }
 0x6e7   :  { %v1908_v48 = vmul.f32 -1.442695, %v1432_v18  ;;  %v1446_v47 = vadd.f32 %v1384_v35, %v1342_v44 }
 0x6e8   :  { %v1386_v45 = vpop.f32.mrf.mxu0  ;;  %v1428_v49 = vpop.f32.mrf.mxu1 }
 0x6e9   :  { %2352 = vpow2.f32 %v1908_v48  ;;  %v1433_v51 = vadd.f32 %v1386_v45, %v1344_v34  ;;  %v1910_v43 = vmul.f32 -1.442695, %v1446_v47  ;;  %v1461_v12 = vadd.f32 %v3135_v3, %v1428_v49  ;;  %v1482_v49 = vpop.permute.xlu0 %1481 }
 0x6ea   :  { %v2145_v54 = vpop.f32.mrf.mxu1  ;;  %v1388_v59 = vpop.f32.mrf.mxu0  ;;  %vm1486_vm13 = vcmp.eq.s32.totalorder %v1482_v49, 1 }
 0x6eb   :  { %v1909_v56 = vmul.f32 -1.442695, %v1433_v51  ;;  %v1447_v22 = vadd.f32 %v1388_v59, %v1345_v38 }
 0x6ed   :  { %2354 = vpow2.f32 %v1909_v56  ;;  %v1911_v50 = vmul.f32 -1.442695, %v1447_v22  ;;  %v1485_v56 = vpop.permute.xlu1 %1484 }
 0x6ee   :  { %2356 = vpow2.f32 %v1910_v43  ;;  %vm1487_vm14 = vcmp.eq.s32.totalorder %v1485_v56, 1  ;;  %v1645_v56 = vld [vmem:[#allocation2 + $0xa8] sm:$0xff] }
 0x6ef   :  { %2358 = vpow2.f32 %v1911_v50 }
 0x6f6   :  { %v2353_v6 = vpop.eup %2352 }
 0x6f7   :  { %v1440_v7 = vadd.f32 1.0, %v2353_v6  ;;  %v1492_v6 = vld [vmem:[#allocation2 + $0x98] ss:$12 sps:$4 sm:$0xff]  }
 0x6f9   :  { %2360 = vrcp.f32 %v1440_v7 }
 0x6fa   :  { %v2355_v61 = vpop.eup %2354 }
 0x6fb   :  { %v1441_v53 = vadd.f32 1.0, %v2355_v61  ;;  %v2357_v63 = vpop.eup %2356 }
 0x6fc   :  { %v2359_v0 = vpop.eup %2358  ;;  %v1454_v1 = vadd.f32 1.0, %v2357_v63 }
 0x6fd   :  { %2362 = vrcp.f32 %v1441_v53  ;;  %v1455_v62 = vadd.f32 1.0, %v2359_v0  ;;  %v1497_v53 = vunpack.c.l.bf16 %v1492_v6 }
 0x6fe   :  { %2364 = vrcp.f32 %v1454_v1 }
 0x6ff   :  { %2366 = vrcp.f32 %v1455_v62 }
 0x706   :  { %v2361_v55 = vpop.eup %2360 }
 0x707   :  { %v1462_v4 = vmul.f32 %v2361_v55, %v1460_v52  ;;  %v1500_v52 = vunpack.c.h.bf16 %v1492_v6 }
 0x709   :  { %v1464_v40 = vadd.f32 %v1462_v4, %v1343_v2 }
 0x70a   :  { %v2363_v15 = vpop.eup %2362 }
 0x70b   :  { %2368 = vtanh.f32 %v1464_v40  ;;  %v1463_v16 = vmul.f32 %v2363_v15, %v1461_v12  ;;  %v2365_v34 = vpop.eup %2364 }
 0x70c   :  { %v2367_v35 = vpop.eup %2366  ;;  %v1468_v11 = vsub.f32 1.0, %v2365_v34  ;;  %v1472_v45 = vmul.f32 %v2365_v34, %v3082_v5 }
 0x70d   :  { %v1465_v18 = vadd.f32 %v1463_v16, %v1346_v10  ;;  %v1469_v17 = vsub.f32 1.0, %v2367_v35  ;;  %v1473_v54 = vmul.f32 %v2367_v35, %v3085_v8 }
 0x70f   :  { %2370 = vtanh.f32 %v1465_v18 }
 0x718   :  { %v2369_v48 = vpop.eup %2368 }
 0x719   :  { %v1470_v44 = vmul.f32 %v2369_v48, %v1468_v11 }
 0x71b   :  { %v1474_v47 = vadd.f32 %v1472_v45, %v1470_v44  ;;  %v1636_v45 = vpop.permute.xlu0 %1635 }
 0x71c   :  { %v2371_v51 = vpop.eup %2370 }
 0x71d   :  { %v1471_v38 = vmul.f32 %v2371_v51, %v1469_v17  ;;  %v3142_v22 = vsel %vm1486_vm13, %v1474_v47, %v3082_v5  ;;  %v1639_v51 = vpop.permute.xlu1 %1638 }
 0x71e   :  { %vm1641_vm15 = vcmp.eq.s32.totalorder %v1639_v51, 1 }
 0x71f   :  { %v1475_v59 = vadd.f32 %v1473_v54, %v1471_v38 }
 0x721   :  { %v3145_v43 = vsel %vm1487_vm14, %v1475_v59, %v3085_v8  ;;  %v1649_v59 = vunpack.c.l.bf16 %v1645_v56 }
 0x722   :  { %v1501_v50 = vpack.c.bf16 %v3145_v43, %v3142_v22 }
 0x724   :  { %1535 = vmatmul.mubr.bf16.vlgmr.msra.gmra.mxu0 %v1501_v50  ;;  %2163 = vmatmul.mubr.bf16.vlgmr.msra.gmra.mxu1 %v1501_v50  ;;  %v1647_v50 = vld [vmem:[#allocation2 + $0xb4] sm:$0xff] }
 0x725   :  { %1657 = vmatpush1.bf16.msra.mxu0 %v3002_v23  ;;  %2167 = vmatpush3.bf16.msra.mxu1 %v3005_v24  ;;  %v1493_v24 = vld [vmem:[#allocation2 + $0x9c] sm:$0xff] }
 0x726   :  { %1658 = vmatprep.subr.bf16.mxu0 %v3008_v25  ;;  %2168 = vmatprep.subr.bf16.mxu1 %v2539_v14 }
 0x727   :  { %1688 = vmatprep.mubr.bf16.mxu0 %v2540_v20  ;;  %2182 = vmatprep.mubr.msk.bf16.mxu1 %vm2541_vm1, %v2539_v14  ;;  %v1491_v20 = vld [vmem:[#allocation2 + $0x90] sm:$0xff]  ;;  %vm1640_vm1 = vcmp.eq.s32.totalorder %v1636_v45, 1 }
 0x728   :  { %v1495_v23 = vunpack.c.l.bf16 %v1491_v20 }
 0x729   :  { %1659 = vmatpush1.bf16.msra.mxu0 %v3015_v57  ;;  %2169 = vmatpush3.bf16.msra.mxu1 %v3018_v58 }
 0x72a   :  { %1660 = vmatprep.subr.bf16.mxu0 %v3021_v26  ;;  %2170 = vmatprep.subr.bf16.mxu1 %v2539_v14  ;;  %v1498_v26 = vunpack.c.l.bf16 %v1493_v24 }
 0x72d   :  { %1661 = vmatpush1.bf16.msra.mxu0 %v3025_v27  ;;  %2171 = vmatpush3.bf16.msra.mxu1 %v3028_v28 }
 0x72e   :  { %1662 = vmatprep.subr.bf16.mxu0 %v3031_v29  ;;  %2172 = vmatprep.subr.bf16.mxu1 %v2539_v14 }
 0x731   :  { %1663 = vmatpush1.bf16.msra.mxu0 %v3035_v30  ;;  %2173 = vmatpush3.bf16.msra.mxu1 %v3038_v31  ;;  %v1496_v30 = vunpack.c.h.bf16 %v1491_v20 }
 0x732   :  { %1664 = vmatprep.subr.bf16.mxu0 %v3041_v32  ;;  %2174 = vmatprep.subr.bf16.mxu1 %v2539_v14 }
 0x735   :  { %1665 = vmatpush1.bf16.msra.mxu0 %v3045_v33  ;;  %2175 = vmatpush3.bf16.msra.mxu1 %v3109_v13 }
 0x736   :  { %1666 = vmatprep.subr.bf16.mxu0 %v3049_v36  ;;  %2176 = vmatprep.subr.bf16.mxu1 %v2539_v14 }
 0x739   :  { %1667 = vmatpush1.bf16.msra.mxu0 %v3053_v37  ;;  %2177 = vmatpush3.bf16.msra.mxu1 %v3115_v21 }
 0x73a   :  { %1668 = vmatprep.subr.bf16.mxu0 %v3057_v19  ;;  %2178 = vmatprep.subr.bf16.mxu1 %v2539_v14 }
 0x73d   :  { %1669 = vmatpush1.bf16.msra.mxu0 %v3061_v39  ;;  %2179 = vmatpush3.bf16.msra.mxu1 %v3121_v46 }
 0x73e   :  { %1670 = vmatprep.subr.bf16.mxu0 %v3065_v42  ;;  %2180 = vmatprep.subr.bf16.mxu1 %v2539_v14  ;;  %v1499_v14 = vunpack.c.h.bf16 %v1493_v24 }
 0x741   :  { %1671 = vmatpush1.bf16.msra.mxu0 %v3069_v41  ;;  %2181 = vmatpush3.bf16.msra.mxu1 %v3127_v9 }
 0x7e4   :  { %v1536_v25 = vpop.f32.mrf.mxu0  ;;  %v1579_v57 = vpop.f32.mrf.mxu1 }
 0x7e5   :  { %v1586_v58 = vadd.f32 %v1536_v25, %v1495_v23  ;;  %v1614_v63 = vadd.f32 %v3135_v3, %v1579_v57  ;;  %v1652_v25 = vunpack.c.l.bf16 %v1647_v50 }
 0x7e6   :  { %v1538_v27 = vpop.f32.mrf.mxu0  ;;  %v2164_v28 = vpop.f32.mrf.mxu1 }
 0x7e7   :  { %v1912_v29 = vmul.f32 -1.442695, %v1586_v58  ;;  %v1600_v37 = vadd.f32 %v1538_v27, %v1496_v30 }
 0x7e8   :  { %v1540_v31 = vpop.f32.mrf.mxu0  ;;  %v1582_v32 = vpop.f32.mrf.mxu1 }
 0x7e9   :  { %2372 = vpow2.f32 %v1912_v29  ;;  %v1587_v33 = vadd.f32 %v1540_v31, %v1498_v26  ;;  %v1914_v41 = vmul.f32 -1.442695, %v1600_v37  ;;  %v1615_v55 = vadd.f32 %v3135_v3, %v1582_v32 }
 0x7ea   :  { %v2165_v36 = vpop.f32.mrf.mxu1  ;;  %v1542_v39 = vpop.f32.mrf.mxu0  ;;  %v1653_v29 = vunpack.c.h.bf16 %v1647_v50 }
 0x7eb   :  { %v1913_v19 = vmul.f32 -1.442695, %v1587_v33  ;;  %v1601_v42 = vadd.f32 %v1542_v39, %v1499_v14 }
 0x7ed   :  { %2374 = vpow2.f32 %v1913_v19  ;;  %v1915_v5 = vmul.f32 -1.442695, %v1601_v42 }
 0x7ee   :  { %2376 = vpow2.f32 %v1914_v41 }
 0x7ef   :  { %2378 = vpow2.f32 %v1915_v5 }
 0x7f6   :  { %v2373_v8 = vpop.eup %2372 }
 0x7f7   :  { %v1594_v13 = vadd.f32 1.0, %v2373_v8  ;;  %v1646_v8 = vld [vmem:[#allocation2 + $0xb0] ss:$12 sps:$4 sm:$0xff]  }
 0x7f9   :  { %2380 = vrcp.f32 %v1594_v13 }
 0x7fa   :  { %v2375_v21 = vpop.eup %2374 }
 0x7fb   :  { %v1595_v46 = vadd.f32 1.0, %v2375_v21  ;;  %v2377_v9 = vpop.eup %2376 }
 0x7fc   :  { %v2379_v7 = vpop.eup %2378  ;;  %v1608_v61 = vadd.f32 1.0, %v2377_v9 }
 0x7fd   :  { %2382 = vrcp.f32 %v1595_v46  ;;  %v1609_v0 = vadd.f32 1.0, %v2379_v7  ;;  %v1651_v46 = vunpack.c.l.bf16 %v1646_v8 }
 0x7fe   :  { %2384 = vrcp.f32 %v1608_v61 }
 0x7ff   :  { %2386 = vrcp.f32 %v1609_v0 }
 0x806   :  { %v2381_v60 = vpop.eup %2380 }
 0x807   :  { %v1616_v1 = vmul.f32 %v2381_v60, %v1614_v63  ;;  %v1654_v63 = vunpack.c.h.bf16 %v1646_v8 }
 0x809   :  { %v1618_v2 = vadd.f32 %v1616_v1, %v1497_v53 }
 0x80a   :  { %v2383_v62 = vpop.eup %2382 }
 0x80b   :  { %2388 = vtanh.f32 %v1618_v2  ;;  %v1617_v4 = vmul.f32 %v2383_v62, %v1615_v55  ;;  %v2385_v10 = vpop.eup %2384 }
 0x80c   :  { %v2387_v12 = vpop.eup %2386  ;;  %v1622_v15 = vsub.f32 1.0, %v2385_v10  ;;  %v1626_v35 = vmul.f32 %v2385_v10, %v3142_v22 }
 0x80d   :  { %v1619_v40 = vadd.f32 %v1617_v4, %v1500_v52  ;;  %v1623_v34 = vsub.f32 1.0, %v2387_v12  ;;  %v1627_v44 = vmul.f32 %v2387_v12, %v3145_v43 }
 0x80f   :  { %2390 = vtanh.f32 %v1619_v40  ;;  %v1790_v40 = vpop.permute.xlu0 %1789 }
 0x810   :  { %vm1794_vm0 = vcmp.eq.s32.totalorder %v1790_v40, 1 }
 0x818   :  { %v2389_v16 = vpop.eup %2388 }
 0x819   :  { %v1624_v18 = vmul.f32 %v2389_v16, %v1622_v15 }
 0x81b   :  { %v1628_v17 = vadd.f32 %v1626_v35, %v1624_v18 }
 0x81c   :  { %v2391_v11 = vpop.eup %2390 }
 0x81d   :  { %v1625_v48 = vmul.f32 %v2391_v11, %v1623_v34  ;;  %v3187_v54 = vsel %vm1640_vm1, %v1628_v17, %v3142_v22  ;;  %v1650_v22 = vunpack.c.h.bf16 %v1645_v56 }
 0x81f   :  { %v1629_v38 = vadd.f32 %v1627_v44, %v1625_v48 }
 0x821   :  { %v3190_v47 = vsel %vm1641_vm15, %v1629_v38, %v3145_v43 }
 0x822   :  { %v1655_v49 = vpack.c.bf16 %v3190_v47, %v3187_v54 }
 0x824   :  { %1689 = vmatmul.mubr.bf16.vlgmr.msra.gmra.mxu0 %v1655_v49  ;;  %2183 = vmatmul.mubr.bf16.vlgmr.msra.gmra.mxu1 %v1655_v49 }
 0x8e4   :  { %v1690_v20 = vpop.f32.mrf.mxu0  ;;  %v1733_v23 = vpop.f32.mrf.mxu1 }
 0x8e5   :  { %v1740_v24 = vadd.f32 %v1690_v20, %v1649_v59  ;;  %v1768_v9 = vadd.f32 %v3135_v3, %v1733_v23 }
 0x8e6   :  { %v1692_v57 = vpop.f32.mrf.mxu0  ;;  %v2184_v58 = vpop.f32.mrf.mxu1 }
 0x8e7   :  { %v1916_v26 = vmul.f32 -1.442695, %v1740_v24  ;;  %v1754_v31 = vadd.f32 %v1692_v57, %v1650_v22 }
 0x8e8   :  { %v1694_v27 = vpop.f32.mrf.mxu0  ;;  %v1736_v28 = vpop.f32.mrf.mxu1 }
 0x8e9   :  { %2392 = vpow2.f32 %v1916_v26  ;;  %v1741_v43 = vadd.f32 %v1694_v27, %v1652_v25  ;;  %v1918_v36 = vmul.f32 -1.442695, %v1754_v31  ;;  %v1769_v60 = vadd.f32 %v3135_v3, %v1736_v28  ;;  %v1793_v3 = vpop.permute.xlu1 %1792 }
 0x8ea   :  { %v2185_v30 = vpop.f32.mrf.mxu1  ;;  %v1696_v33 = vpop.f32.mrf.mxu0  ;;  %vm1795_vm2 = vcmp.eq.s32.totalorder %v1793_v3, 1 }
 0x8eb   :  { %v1917_v32 = vmul.f32 -1.442695, %v1741_v43  ;;  %v1755_v14 = vadd.f32 %v1696_v33, %v1653_v29 }
 0x8ed   :  { %2394 = vpow2.f32 %v1917_v32  ;;  %v1919_v37 = vmul.f32 -1.442695, %v1755_v14 }
 0x8ee   :  { %2396 = vpow2.f32 %v1918_v36 }
 0x8ef   :  { %2398 = vpow2.f32 %v1919_v37 }
 0x8f6   :  { %v2393_v19 = vpop.eup %2392 }
 0x8f7   :  { %v1748_v39 = vadd.f32 1.0, %v2393_v19 }
 0x8f9   :  { %2400 = vrcp.f32 %v1748_v39 }
 0x8fa   :  { %v2395_v42 = vpop.eup %2394 }
 0x8fb   :  { %v1749_v41 = vadd.f32 1.0, %v2395_v42  ;;  %v2397_v5 = vpop.eup %2396 }
 0x8fc   :  { %v2399_v13 = vpop.eup %2398  ;;  %v1762_v21 = vadd.f32 1.0, %v2397_v5 }
 0x8fd   :  { %2402 = vrcp.f32 %v1749_v41  ;;  %v1763_v7 = vadd.f32 1.0, %v2399_v13 }
 0x8fe   :  { %2404 = vrcp.f32 %v1762_v21 }
 0x8ff   :  { %2406 = vrcp.f32 %v1763_v7 }
 0x906   :  { %v2401_v6 = vpop.eup %2400 }
 0x907   :  { %v1770_v61 = vmul.f32 %v2401_v6, %v1768_v9 }
 0x909   :  { %v1772_v53 = vadd.f32 %v1770_v61, %v1651_v46 }
 0x90a   :  { %v2403_v0 = vpop.eup %2402 }
 0x90b   :  { %2408 = vtanh.f32 %v1772_v53  ;;  %v1771_v1 = vmul.f32 %v2403_v0, %v1769_v60  ;;  %v2405_v52 = vpop.eup %2404 }
 0x90c   :  { %v2407_v55 = vpop.eup %2406  ;;  %v1776_v62 = vsub.f32 1.0, %v2405_v52  ;;  %v1780_v12 = vmul.f32 %v2405_v52, %v3187_v54 }
 0x90d   :  { %v1773_v2 = vadd.f32 %v1771_v1, %v1654_v63  ;;  %v1777_v15 = vsub.f32 1.0, %v2407_v55  ;;  %v1781_v35 = vmul.f32 %v2407_v55, %v3190_v47 }
 0x90f   :  { %2410 = vtanh.f32 %v1773_v2 }
 0x918   :  { %v2409_v4 = vpop.eup %2408 }
 0x919   :  { %v1778_v10 = vmul.f32 %v2409_v4, %v1776_v62 }
 0x91b   :  { %v1782_v16 = vadd.f32 %v1780_v12, %v1778_v10 }
 0x91c   :  { %v2411_v18 = vpop.eup %2410 }
 0x91d   :  { %v1779_v34 = vmul.f32 %v2411_v18, %v1777_v15  ;;  %v1796_v11 = vsel %vm1794_vm0, %v1782_v16, %v3187_v54 }
 0x91e   :  { %1798 = vst [vmem:[#allocation11] sm:$0xff] %v1796_v11 }
 0x91f   :  { %v1783_v48 = vadd.f32 %v1781_v35, %v1779_v34 }
 0x921   :  { %v1797_v44 = vsel %vm1795_vm2, %v1783_v48, %v3190_v47 }
 0x922   :  { %1799 = vst [vmem:[#allocation11 + $0x8] sm:$0xff] %v1797_v44 }
 0x923   :  { %2508 = shalt.err (!%p2505_p6)
}
 0x924   :  { %s2543_s15 = smov 128   ;;  %s2544_s16 = smov 8  }
 0x925   :  { %1811 = dma.vmem_to_hbm [thread:$0]  %s1806_s13, 256, %s3211_s8, [#allocation7], %s2543_s15, %s2543_s15, %s2544_s16  }
 0x926   :  { %2525 = dma.done.wait [#allocation7], 256  }
 0x927   :  { %2526 = vsyncadd [#allocation7], 4294967040 }
 0x928   :  { %1815 = vsyncpa [#allocation6], 1 }
 0x929   :  { %1816 = vsyncpa [#allocation9], 1 }
 0x92a   :  { %1817 = vsyncpa [#allocation7], 1 }

</bundles_post_ra>
